<compile_context>
chip_gen: v5e
topology: v5e:2x2
jax: 0.10.0
libtpu: 0.0.40
codegen_flags: <defaults>
</compile_context>

<pallas_src>
import math

import jax
import jax.numpy as jnp
import numpy as np
from jax.experimental import pallas as pl
from jax.experimental.pallas import tpu as pltpu


def _layernorm(x, gamma, beta, eps=1e-5):
    mu = jnp.mean(x, axis=-1, keepdims=True)
    var = jnp.mean((x - mu) ** 2, axis=-1, keepdims=True)   # biased var (PyTorch LayerNorm)
    return (x - mu) * jax.lax.rsqrt(var + eps) * gamma + beta


def _rows_to_lanes(x, bb, n):
    """(bb*n, C) -> (bb, n*C) via leading-dim reshape + static slices + lane concat."""
    x3 = x.reshape(bb, n, x.shape[-1])            # leading-dim split only: free
    return jnp.concatenate([x3[:, i, :] for i in range(n)], axis=-1)


def _attention_kernel(mem_ref, x_ref, prm_ref,
                      wq_ref, wkv_ref, amat_ref, bmat_ref, dmat_ref, fmat_ref,
                      wc_ref, w1_ref, w2_ref, w3_ref, o_ref):
    bb, N, D = mem_ref.shape
    DD = wq_ref.shape[1]                          # (N+1) * D
    R = bb * N

    prm = prm_ref[...]
    gamma, beta = prm[0:1, :], prm[1:2, :]
    bc, b1, b2, b3 = prm[2:3, :], prm[3:4, :], prm[4:5, :], prm[5:6, :]

    mem_rows = mem_ref[...].reshape(R, D)         # (R, D) f32
    x_in = x_ref[...]                             # (bb, D) f32 external token (NOT normed)

    # x = norm(memory)
    xnorm = _layernorm(mem_rows, gamma, beta)
    xnorm_b = xnorm.astype(jnp.bfloat16)

    # q projected directly into the replicated layout: q_rep[bi, j*D+m] = scale * q[bi, m]
    q_rep = jnp.dot(xnorm_b, wq_ref[...], preferred_element_type=jnp.float32)      # (R, DD)

    # fused k|v projections (same weight for memory rows and the external token)
    kv_m = jnp.dot(xnorm_b, wkv_ref[...], preferred_element_type=jnp.float32)      # (R, 2D)
    kv_x = jnp.dot(x_in.astype(jnp.bfloat16), wkv_ref[...],
                   preferred_element_type=jnp.float32)                             # (bb, 2D)

    # per-batch flattened key/value blocks, external token appended as key index N
    k_all = jnp.concatenate(
        [_rows_to_lanes(kv_m[:, :D], bb, N), kv_x[:, :D]], axis=-1)                # (bb, DD)
    v_all = jnp.concatenate(
        [_rows_to_lanes(kv_m[:, D:], bb, N), kv_x[:, D:]], axis=-1)                # (bb, DD)

    # broadcast each batch element's key/value block over its N query rows
    k_bcast = jnp.broadcast_to(k_all[:, None, :], (bb, N, DD)).reshape(R, DD)
    v_bcast = jnp.broadcast_to(v_all[:, None, :], (bb, N, DD)).reshape(R, DD)

    # scores: elementwise q*k products, then head-segmented reduce via one constant matmul
    prod = (q_rep * k_bcast).astype(jnp.bfloat16)                                  # (R, DD)
    s_c = jnp.dot(prod, amat_ref[...], preferred_element_type=jnp.float32)         # (R, H*(N+1))

    # softmax per head over its N+1 keys; a per-row max (>= every head's max) is a valid
    # stabilizer and keeps the reduction a single dense lane-reduce
    m_row = jnp.max(s_c, axis=-1, keepdims=True)
    e_c = jnp.exp(s_c - m_row)
    e_b = e_c.astype(jnp.bfloat16)
    e_rep = jnp.dot(e_b, bmat_ref[...], preferred_element_type=jnp.float32)        # (R, DD)
    den = jnp.dot(e_b, dmat_ref[...], preferred_element_type=jnp.float32)          # (R, D)

    ctx = jnp.dot((e_rep * v_bcast).astype(jnp.bfloat16), fmat_ref[...],
                  preferred_element_type=jnp.float32)                              # (R, D)
    attn = ctx * pl.reciprocal(den, approx=True)

    # w_concat (Linear with bias)
    attn = jnp.dot(attn.astype(jnp.bfloat16), wc_ref[...],
                   preferred_element_type=jnp.float32) + bc

    # x = relu(attn) + memory ; x_ = norm(x)
    x1 = jnp.maximum(attn, 0.0) + mem_rows
    x_ = _layernorm(x1, gamma, beta)

    # attention_mlp: Linear -> ReLU -> Linear -> ReLU -> Linear
    h1 = jnp.maximum(jnp.dot(x_.astype(jnp.bfloat16), w1_ref[...],
                             preferred_element_type=jnp.float32) + b1, 0.0)
    h2 = jnp.maximum(jnp.dot(h1.astype(jnp.bfloat16), w2_ref[...],
                             preferred_element_type=jnp.float32) + b2, 0.0)
    mlp = jnp.dot(h2.astype(jnp.bfloat16), w3_ref[...],
                  preferred_element_type=jnp.float32) + b3

    out = jnp.maximum(mlp, 0.0) + x_                                               # (R, D)
    # lane-dense store: (R, D) -> (bb, N*D) so o_ref gets full 128-lane writes
    o_ref[...] = _rows_to_lanes(out, bb, N).astype(o_ref.dtype)


def _make_constant_mats(D, n_head, N):
    d = D // n_head
    Nk = N + 1
    DD = Nk * D
    A = np.zeros((DD, n_head * Nk), np.float32)    # head-segmented score reduce
    B = np.zeros((n_head * Nk, DD), np.float32)    # probability expansion
    Dm = np.zeros((n_head * Nk, D), np.float32)    # softmax denominator (replicated)
    F = np.zeros((DD, D), np.float32)              # sum over keys (identity stack)
    for j in range(Nk):
        F[j * D:(j + 1) * D, :] = np.eye(D, dtype=np.float32)
        for h in range(n_head):
            t = h * Nk + j
            A[j * D + h * d:j * D + (h + 1) * d, t] = 1.0
            B[t, j * D + h * d:j * D + (h + 1) * d] = 1.0
            Dm[t, h * d:(h + 1) * d] = 1.0
    return A, B, Dm, F


def _choose_batch_block(B, block_b):
    """Largest batch block dividing B (multiple of 8 when splitting) -> no padding."""
    if B <= block_b:
        return B
    cap = (min(block_b, B) // 8) * 8
    for cand in range(cap, 7, -8):
        if B % cand == 0:
            return cand
    return 0   # no clean divisor; caller pads (rare)


def self_attention_layer(memory, inp, params, n_head, block_b=256):
    B, N, D = memory.shape
    gamma, beta, wq, wk, wv, wc, bc, w1, b1, w2, b2, w3, b3 = params
    d = D // n_head
    Nk = N + 1
    scale = 1.0 / math.sqrt(d)

    # ---- weight prep (wrapper-side, tiny) -----------------------------------------
    wq_tiled = jnp.tile(jnp.asarray(wq) * scale, (1, Nk)).astype(jnp.bfloat16)   # (D, Nk*D)
    wkv = jnp.concatenate([wk, wv], axis=1).astype(jnp.bfloat16)                  # (D, 2D)
    wc_b, w1_b, w2_b, w3_b = (w.astype(jnp.bfloat16) for w in (wc, w1, w2, w3))

    A, Bm, Dm, Fm = _make_constant_mats(D, n_head, N)
    A = jnp.asarray(A, jnp.bfloat16)
    Bm = jnp.asarray(Bm, jnp.bfloat16)
    Dm = jnp.asarray(Dm, jnp.bfloat16)
    Fm = jnp.asarray(Fm, jnp.bfloat16)

    def _row(p):
        return jnp.asarray(p, jnp.float32).reshape(1, D)

    # gamma/beta + all biases packed into one (8, D) parameter block
    prm = jnp.concatenate([_row(gamma), _row(beta), _row(bc), _row(b1), _row(b2),
                           _row(b3), jnp.zeros((2, D), jnp.float32)], axis=0)

    # ---- batch blocking -------------------------------------------------------------
    # No forced multi-step split (single-TC v5e/v6e); bb divides B so no wrapper padding.
    # On v7x, any g > 1 shards the 'parallel' batch axis across the two TensorCores.
    bb = _choose_batch_block(B, block_b)
    if bb:
        g, Bp = B // bb, B
        mem_in, x_in = memory, inp
    else:   # rare fallback (no suitable divisor): pad batch to a round block
        bb = min((block_b // 8) * 8, 8 * ((B + 7) // 8))
        g = pl.cdiv(B, bb)
        Bp = g * bb
        mem_in = jnp.pad(memory, ((0, Bp - B), (0, 0), (0, 0)))
        x_in = jnp.pad(inp, ((0, Bp - B), (0, 0)))

    def _full(shape):
        return pl.BlockSpec(shape, lambda i: (0, 0))

    in_specs = [
        pl.BlockSpec((bb, N, D), lambda i: (i, 0, 0)),    # memory block
        pl.BlockSpec((bb, D), lambda i: (i, 0)),          # external input token block
        _full((8, D)),                                    # gamma/beta + biases
        _full((D, Nk * D)),                               # Wq (tiled, scale folded in)
        _full((D, 2 * D)),                                # Wk|Wv fused
        _full((Nk * D, n_head * Nk)),                     # A
        _full((n_head * Nk, Nk * D)),                     # B
        _full((n_head * Nk, D)),                          # Dm
        _full((Nk * D, D)),                               # F
        _full((D, D)), _full((D, D)), _full((D, D)), _full((D, D)),   # Wc, W1, W2, W3
    ]
    out_specs = pl.BlockSpec((bb, N * D), lambda i: (i, 0))

    out = pl.pallas_call(
        _attention_kernel,
        out_shape=jax.ShapeDtypeStruct((Bp, N * D), jnp.float32),
        grid_spec=pltpu.PrefetchScalarGridSpec(
            num_scalar_prefetch=0,
            grid=(g,),
            in_specs=in_specs,
            out_specs=out_specs,
        ),
        compiler_params=pltpu.CompilerParams(
            dimension_semantics=("parallel",),
            vmem_limit_bytes=48 * 1024 * 1024,
        ),
    )(mem_in, x_in, prm, wq_tiled, wkv, A, Bm, Dm, Fm, wc_b, w1_b, w2_b, w3_b)

    return out[:B].reshape(B, N, D)


def ref_forward(memory, inp, params, n_head):
    """Pure-JAX f32 reference (mirrors the PyTorch module exactly)."""
    gamma, beta, wq, wk, wv, wc, bc, w1, b1, w2, b2, w3, b3 = params

    def ln(x):
        mu = x.mean(-1, keepdims=True)
        var = ((x - mu) ** 2).mean(-1, keepdims=True)
        return (x - mu) / jnp.sqrt(var + 1e-5) * gamma + beta

    B, N, D = memory.shape
    d = D // n_head

    x = ln(memory)
    q = x @ wq
    kv_in = jnp.concatenate([x, inp[:, None, :]], axis=1)
    k = kv_in @ wk
    v = kv_in @ wv

    def split(t):
        return t.reshape(t.shape[0], t.shape[1], n_head, d).transpose(0, 2, 1, 3)

    qs, ks, vs = split(q), split(k), split(v)
    s = jnp.einsum('bhnd,bhmd->bhnm', qs, ks) / math.sqrt(d)
    p = jax.nn.softmax(s, axis=-1)
    o = jnp.einsum('bhnm,bhmd->bhnd', p, vs)
    o = o.transpose(0, 2, 1, 3).reshape(B, N, D)
    o = o @ wc + bc

    x1 = jnp.maximum(o, 0) + memory
    x_ = ln(x1)
    h1 = jnp.maximum(x_ @ w1 + b1, 0)
    h2 = jnp.maximum(h1 @ w2 + b2, 0)
    mlp = h2 @ w3 + b3
    return jnp.maximum(mlp, 0) + x_


if __name__ == "__main__":
    B, N, D, H = 8, 8, 32, 4   # batch, num_memories, size_memory, n_head
    key = jax.random.PRNGKey(0)
    ks = jax.random.split(key, 16)

    memory = jax.random.normal(ks[0], (B, N, D), jnp.float32)
    inp = jax.random.normal(ks[1], (B, D), jnp.float32)

    def w(k):   # (in, out) weight
        return 0.1 * jax.random.normal(k, (D, D), jnp.float32)

    def b(k):
        return 0.1 * jax.random.normal(k, (1, D), jnp.float32)

    params = (
        jnp.ones((1, D), jnp.float32),    # LayerNorm gamma (PyTorch default init)
        jnp.zeros((1, D), jnp.float32),   # LayerNorm beta
        w(ks[2]), w(ks[3]), w(ks[4]),     # Wq, Wk, Wv (no bias)
        w(ks[5]), b(ks[6]),               # w_concat, b_concat
        w(ks[7]), b(ks[8]),               # mlp hidden 1
        w(ks[9]), b(ks[10]),              # mlp hidden 2
        w(ks[11]), b(ks[12]),             # mlp output
    )

    out = self_attention_layer(memory, inp, params, H)
    out = jax.block_until_ready(out)

    expected = ref_forward(memory, inp, params, H)
    # bf16 MXU operands (f32 accumulation) vs. an f32 reference -> loosened tolerance.
    np.testing.assert_allclose(np.asarray(out), np.asarray(expected), rtol=2e-2, atol=2e-2)

    print("KERNEL_OK")
</pallas_src>

<mosaic_0001>
module attributes {stable_mosaic.version = 11 : i64} {
  func.func @_attention_kernel(%arg0: i32, %arg1: memref<8x8x32xf32, #tpu.memory_space<vmem>>, %arg2: memref<8x32xf32, #tpu.memory_space<vmem>>, %arg3: memref<8x32xf32, #tpu.memory_space<vmem>>, %arg4: memref<32x288xbf16, #tpu.memory_space<vmem>>, %arg5: memref<32x64xbf16, #tpu.memory_space<vmem>>, %arg6: memref<288x36xbf16, #tpu.memory_space<vmem>>, %arg7: memref<36x288xbf16, #tpu.memory_space<vmem>>, %arg8: memref<36x32xbf16, #tpu.memory_space<vmem>>, %arg9: memref<288x32xbf16, #tpu.memory_space<vmem>>, %arg10: memref<32x32xbf16, #tpu.memory_space<vmem>>, %arg11: memref<32x32xbf16, #tpu.memory_space<vmem>>, %arg12: memref<32x32xbf16, #tpu.memory_space<vmem>>, %arg13: memref<32x32xbf16, #tpu.memory_space<vmem>>, %arg14: memref<8x256xf32, #tpu.memory_space<vmem>>) attributes {dimension_semantics = [#tpu.dimension_semantics<parallel>], iteration_bounds = array<i64: 1>, scalar_prefetch = 0 : i64, scratch_operands = 0 : i64, tpu.core_type = #tpu.core_type<tc>, window_params = [{transform_indices = @transform_0, window_bounds = array<i64: 8, 8, 32>}, {transform_indices = @transform_1, window_bounds = array<i64: 8, 32>}, {pipeline_mode = #tpu.pipeline_mode<synchronous>, transform_indices = @transform_2, window_bounds = array<i64: 8, 32>}, {pipeline_mode = #tpu.pipeline_mode<synchronous>, transform_indices = @transform_3, window_bounds = array<i64: 32, 288>}, {pipeline_mode = #tpu.pipeline_mode<synchronous>, transform_indices = @transform_4, window_bounds = array<i64: 32, 64>}, {pipeline_mode = #tpu.pipeline_mode<synchronous>, transform_indices = @transform_5, window_bounds = array<i64: 288, 36>}, {pipeline_mode = #tpu.pipeline_mode<synchronous>, transform_indices = @transform_6, window_bounds = array<i64: 36, 288>}, {pipeline_mode = #tpu.pipeline_mode<synchronous>, transform_indices = @transform_7, window_bounds = array<i64: 36, 32>}, {pipeline_mode = #tpu.pipeline_mode<synchronous>, transform_indices = @transform_8, window_bounds = array<i64: 288, 32>}, {pipeline_mode = #tpu.pipeline_mode<synchronous>, transform_indices = @transform_9, window_bounds = array<i64: 32, 32>}, {pipeline_mode = #tpu.pipeline_mode<synchronous>, transform_indices = @transform_10, window_bounds = array<i64: 32, 32>}, {pipeline_mode = #tpu.pipeline_mode<synchronous>, transform_indices = @transform_11, window_bounds = array<i64: 32, 32>}, {pipeline_mode = #tpu.pipeline_mode<synchronous>, transform_indices = @transform_12, window_bounds = array<i64: 32, 32>}, {transform_indices = @transform_13, window_bounds = array<i64: 8, 256>}]} {
    %c0 = arith.constant 0 : index
    %c0_0 = arith.constant 0 : index
    %0 = vector.load %arg3[%c0, %c0_0] : memref<8x32xf32, #tpu.memory_space<vmem>>, vector<8x32xf32>
    %1 = vector.extract_strided_slice %0 {offsets = [0, 0], sizes = [1, 32], strides = [1, 1]} : vector<8x32xf32> to vector<1x32xf32>
    %2 = vector.extract_strided_slice %0 {offsets = [1, 0], sizes = [1, 32], strides = [1, 1]} : vector<8x32xf32> to vector<1x32xf32>
    %3 = vector.extract_strided_slice %0 {offsets = [2, 0], sizes = [1, 32], strides = [1, 1]} : vector<8x32xf32> to vector<1x32xf32>
    %4 = vector.extract_strided_slice %0 {offsets = [3, 0], sizes = [1, 32], strides = [1, 1]} : vector<8x32xf32> to vector<1x32xf32>
    %5 = vector.extract_strided_slice %0 {offsets = [4, 0], sizes = [1, 32], strides = [1, 1]} : vector<8x32xf32> to vector<1x32xf32>
    %6 = vector.extract_strided_slice %0 {offsets = [5, 0], sizes = [1, 32], strides = [1, 1]} : vector<8x32xf32> to vector<1x32xf32>
    %c0_1 = arith.constant 0 : index
    %c0_2 = arith.constant 0 : index
    %c0_3 = arith.constant 0 : index
    %7 = vector.load %arg1[%c0_1, %c0_2, %c0_3] : memref<8x8x32xf32, #tpu.memory_space<vmem>>, vector<8x8x32xf32>
    %8 = vector.shape_cast %7 : vector<8x8x32xf32> to vector<64x32xf32>
    %c0_4 = arith.constant 0 : index
    %c0_5 = arith.constant 0 : index
    %9 = vector.load %arg2[%c0_4, %c0_5] : memref<8x32xf32, #tpu.memory_space<vmem>>, vector<8x32xf32>
    %cst = arith.constant dense<0.000000e+00> : vector<64xf32>
    %10 = vector.multi_reduction <add>, %8, %cst [1] : vector<64x32xf32> to vector<64xf32>
    %11 = vector.shape_cast %10 : vector<64xf32> to vector<64x1xf32>
    %cst_6 = arith.constant 3.200000e+01 : f32
    %12 = vector.broadcast %cst_6 : f32 to vector<64x1xf32>
    %13 = arith.divf %11, %12 : vector<64x1xf32>
    %14 = vector.broadcast %13 : vector<64x1xf32> to vector<64x32xf32>
    %15 = arith.subf %8, %14 : vector<64x32xf32>
    %16 = arith.mulf %15, %15 : vector<64x32xf32>
    %cst_7 = arith.constant dense<0.000000e+00> : vector<64xf32>
    %17 = vector.multi_reduction <add>, %16, %cst_7 [1] : vector<64x32xf32> to vector<64xf32>
    %18 = vector.shape_cast %17 : vector<64xf32> to vector<64x1xf32>
    %cst_8 = arith.constant 3.200000e+01 : f32
    %19 = vector.broadcast %cst_8 : f32 to vector<64x1xf32>
    %20 = arith.divf %18, %19 : vector<64x1xf32>
    %21 = vector.broadcast %13 : vector<64x1xf32> to vector<64x32xf32>
    %22 = arith.subf %8, %21 : vector<64x32xf32>
    %cst_9 = arith.constant 9.99999974E-6 : f32
    %23 = vector.broadcast %cst_9 : f32 to vector<64x1xf32>
    %24 = arith.addf %20, %23 : vector<64x1xf32>
    %25 = math.rsqrt %24 : vector<64x1xf32>
    %26 = vector.broadcast %25 : vector<64x1xf32> to vector<64x32xf32>
    %27 = arith.mulf %22, %26 : vector<64x32xf32>
    %28 = vector.broadcast %1 : vector<1x32xf32> to vector<64x32xf32>
    %29 = arith.mulf %27, %28 : vector<64x32xf32>
    %30 = vector.broadcast %2 : vector<1x32xf32> to vector<64x32xf32>
    %31 = arith.addf %29, %30 : vector<64x32xf32>
    %32 = arith.truncf %31 : vector<64x32xf32> to vector<64x32xbf16>
    %c0_10 = arith.constant 0 : index
    %c0_11 = arith.constant 0 : index
    %33 = vector.load %arg4[%c0_10, %c0_11] : memref<32x288xbf16, #tpu.memory_space<vmem>>, vector<32x288xbf16>
    %cst_12 = arith.constant dense<0.000000e+00> : vector<64x288xf32>
    %34 = tpu.matmul %32, %33, %cst_12 {dimension_numbers = #tpu.dot_dimension_numbers<[1], [0], [0], [1], [0, 0, 1, 1], [], []>} : vector<64x32xbf16>, vector<32x288xbf16>, vector<64x288xf32> -> vector<64x288xf32>
    %c0_13 = arith.constant 0 : index
    %c0_14 = arith.constant 0 : index
    %35 = vector.load %arg5[%c0_13, %c0_14] : memref<32x64xbf16, #tpu.memory_space<vmem>>, vector<32x64xbf16>
    %cst_15 = arith.constant dense<0.000000e+00> : vector<64x64xf32>
    %36 = tpu.matmul %32, %35, %cst_15 {dimension_numbers = #tpu.dot_dimension_numbers<[1], [0], [0], [1], [0, 0, 1, 1], [], []>} : vector<64x32xbf16>, vector<32x64xbf16>, vector<64x64xf32> -> vector<64x64xf32>
    %37 = arith.truncf %9 : vector<8x32xf32> to vector<8x32xbf16>
    %c0_16 = arith.constant 0 : index
    %c0_17 = arith.constant 0 : index
    %38 = vector.load %arg5[%c0_16, %c0_17] : memref<32x64xbf16, #tpu.memory_space<vmem>>, vector<32x64xbf16>
    %cst_18 = arith.constant dense<0.000000e+00> : vector<8x64xf32>
    %39 = tpu.matmul %37, %38, %cst_18 {dimension_numbers = #tpu.dot_dimension_numbers<[1], [0], [0], [1], [0, 0, 1, 1], [], []>} : vector<8x32xbf16>, vector<32x64xbf16>, vector<8x64xf32> -> vector<8x64xf32>
    %40 = vector.extract_strided_slice %36 {offsets = [0, 0], sizes = [64, 32], strides = [1, 1]} : vector<64x64xf32> to vector<64x32xf32>
    %41 = vector.shape_cast %40 : vector<64x32xf32> to vector<8x8x32xf32>
    %42 = vector.extract_strided_slice %41 {offsets = [0, 0, 0], sizes = [8, 1, 32], strides = [1, 1, 1]} : vector<8x8x32xf32> to vector<8x1x32xf32>
    %43 = vector.shape_cast %42 : vector<8x1x32xf32> to vector<8x32xf32>
    %44 = vector.extract_strided_slice %41 {offsets = [0, 1, 0], sizes = [8, 1, 32], strides = [1, 1, 1]} : vector<8x8x32xf32> to vector<8x1x32xf32>
    %45 = vector.shape_cast %44 : vector<8x1x32xf32> to vector<8x32xf32>
    %46 = vector.extract_strided_slice %41 {offsets = [0, 2, 0], sizes = [8, 1, 32], strides = [1, 1, 1]} : vector<8x8x32xf32> to vector<8x1x32xf32>
    %47 = vector.shape_cast %46 : vector<8x1x32xf32> to vector<8x32xf32>
    %48 = vector.extract_strided_slice %41 {offsets = [0, 3, 0], sizes = [8, 1, 32], strides = [1, 1, 1]} : vector<8x8x32xf32> to vector<8x1x32xf32>
    %49 = vector.shape_cast %48 : vector<8x1x32xf32> to vector<8x32xf32>
    %50 = vector.extract_strided_slice %41 {offsets = [0, 4, 0], sizes = [8, 1, 32], strides = [1, 1, 1]} : vector<8x8x32xf32> to vector<8x1x32xf32>
    %51 = vector.shape_cast %50 : vector<8x1x32xf32> to vector<8x32xf32>
    %52 = vector.extract_strided_slice %41 {offsets = [0, 5, 0], sizes = [8, 1, 32], strides = [1, 1, 1]} : vector<8x8x32xf32> to vector<8x1x32xf32>
    %53 = vector.shape_cast %52 : vector<8x1x32xf32> to vector<8x32xf32>
    %54 = vector.extract_strided_slice %41 {offsets = [0, 6, 0], sizes = [8, 1, 32], strides = [1, 1, 1]} : vector<8x8x32xf32> to vector<8x1x32xf32>
    %55 = vector.shape_cast %54 : vector<8x1x32xf32> to vector<8x32xf32>
    %56 = vector.extract_strided_slice %41 {offsets = [0, 7, 0], sizes = [8, 1, 32], strides = [1, 1, 1]} : vector<8x8x32xf32> to vector<8x1x32xf32>
    %57 = vector.shape_cast %56 : vector<8x1x32xf32> to vector<8x32xf32>
    %58 = tpu.concatenate %43, %45, %47, %49, %51, %53, %55, %57 in 1 : vector<8x32xf32>, vector<8x32xf32>, vector<8x32xf32>, vector<8x32xf32>, vector<8x32xf32>, vector<8x32xf32>, vector<8x32xf32>, vector<8x32xf32> -> vector<8x256xf32>
    %59 = vector.extract_strided_slice %39 {offsets = [0, 0], sizes = [8, 32], strides = [1, 1]} : vector<8x64xf32> to vector<8x32xf32>
    %60 = tpu.concatenate %58, %59 in 1 : vector<8x256xf32>, vector<8x32xf32> -> vector<8x288xf32>
    %61 = vector.extract_strided_slice %36 {offsets = [0, 32], sizes = [64, 32], strides = [1, 1]} : vector<64x64xf32> to vector<64x32xf32>
    %62 = vector.shape_cast %61 : vector<64x32xf32> to vector<8x8x32xf32>
    %63 = vector.extract_strided_slice %62 {offsets = [0, 0, 0], sizes = [8, 1, 32], strides = [1, 1, 1]} : vector<8x8x32xf32> to vector<8x1x32xf32>
    %64 = vector.shape_cast %63 : vector<8x1x32xf32> to vector<8x32xf32>
    %65 = vector.extract_strided_slice %62 {offsets = [0, 1, 0], sizes = [8, 1, 32], strides = [1, 1, 1]} : vector<8x8x32xf32> to vector<8x1x32xf32>
    %66 = vector.shape_cast %65 : vector<8x1x32xf32> to vector<8x32xf32>
    %67 = vector.extract_strided_slice %62 {offsets = [0, 2, 0], sizes = [8, 1, 32], strides = [1, 1, 1]} : vector<8x8x32xf32> to vector<8x1x32xf32>
    %68 = vector.shape_cast %67 : vector<8x1x32xf32> to vector<8x32xf32>
    %69 = vector.extract_strided_slice %62 {offsets = [0, 3, 0], sizes = [8, 1, 32], strides = [1, 1, 1]} : vector<8x8x32xf32> to vector<8x1x32xf32>
    %70 = vector.shape_cast %69 : vector<8x1x32xf32> to vector<8x32xf32>
    %71 = vector.extract_strided_slice %62 {offsets = [0, 4, 0], sizes = [8, 1, 32], strides = [1, 1, 1]} : vector<8x8x32xf32> to vector<8x1x32xf32>
    %72 = vector.shape_cast %71 : vector<8x1x32xf32> to vector<8x32xf32>
    %73 = vector.extract_strided_slice %62 {offsets = [0, 5, 0], sizes = [8, 1, 32], strides = [1, 1, 1]} : vector<8x8x32xf32> to vector<8x1x32xf32>
    %74 = vector.shape_cast %73 : vector<8x1x32xf32> to vector<8x32xf32>
    %75 = vector.extract_strided_slice %62 {offsets = [0, 6, 0], sizes = [8, 1, 32], strides = [1, 1, 1]} : vector<8x8x32xf32> to vector<8x1x32xf32>
    %76 = vector.shape_cast %75 : vector<8x1x32xf32> to vector<8x32xf32>
    %77 = vector.extract_strided_slice %62 {offsets = [0, 7, 0], sizes = [8, 1, 32], strides = [1, 1, 1]} : vector<8x8x32xf32> to vector<8x1x32xf32>
    %78 = vector.shape_cast %77 : vector<8x1x32xf32> to vector<8x32xf32>
    %79 = tpu.concatenate %64, %66, %68, %70, %72, %74, %76, %78 in 1 : vector<8x32xf32>, vector<8x32xf32>, vector<8x32xf32>, vector<8x32xf32>, vector<8x32xf32>, vector<8x32xf32>, vector<8x32xf32>, vector<8x32xf32> -> vector<8x256xf32>
    %80 = vector.extract_strided_slice %39 {offsets = [0, 32], sizes = [8, 32], strides = [1, 1]} : vector<8x64xf32> to vector<8x32xf32>
    %81 = tpu.concatenate %79, %80 in 1 : vector<8x256xf32>, vector<8x32xf32> -> vector<8x288xf32>
    %82 = vector.shape_cast %60 : vector<8x288xf32> to vector<8x1x288xf32>
    %83 = vector.shape_cast %82 : vector<8x1x288xf32> to vector<8x1x288xf32>
    %84 = vector.broadcast %83 : vector<8x1x288xf32> to vector<8x8x288xf32>
    %85 = vector.shape_cast %84 : vector<8x8x288xf32> to vector<64x288xf32>
    %86 = vector.shape_cast %81 : vector<8x288xf32> to vector<8x1x288xf32>
    %87 = vector.shape_cast %86 : vector<8x1x288xf32> to vector<8x1x288xf32>
    %88 = vector.broadcast %87 : vector<8x1x288xf32> to vector<8x8x288xf32>
    %89 = vector.shape_cast %88 : vector<8x8x288xf32> to vector<64x288xf32>
    %90 = arith.mulf %34, %85 : vector<64x288xf32>
    %91 = arith.truncf %90 : vector<64x288xf32> to vector<64x288xbf16>
    %c0_19 = arith.constant 0 : index
    %c0_20 = arith.constant 0 : index
    %92 = vector.load %arg6[%c0_19, %c0_20] : memref<288x36xbf16, #tpu.memory_space<vmem>>, vector<288x36xbf16>
    %cst_21 = arith.constant dense<0.000000e+00> : vector<64x36xf32>
    %93 = tpu.matmul %91, %92, %cst_21 {dimension_numbers = #tpu.dot_dimension_numbers<[1], [0], [0], [1], [0, 0, 1, 1], [], []>} : vector<64x288xbf16>, vector<288x36xbf16>, vector<64x36xf32> -> vector<64x36xf32>
    %cst_22 = arith.constant dense<0xFF800000> : vector<64xf32>
    %94 = vector.multi_reduction <maximumf>, %93, %cst_22 [1] : vector<64x36xf32> to vector<64xf32>
    %95 = vector.shape_cast %94 : vector<64xf32> to vector<64x1xf32>
    %96 = vector.broadcast %95 : vector<64x1xf32> to vector<64x36xf32>
    %97 = arith.subf %93, %96 : vector<64x36xf32>
    %98 = math.exp %97 : vector<64x36xf32>
    %99 = arith.truncf %98 : vector<64x36xf32> to vector<64x36xbf16>
    %c0_23 = arith.constant 0 : index
    %c0_24 = arith.constant 0 : index
    %100 = vector.load %arg7[%c0_23, %c0_24] : memref<36x288xbf16, #tpu.memory_space<vmem>>, vector<36x288xbf16>
    %cst_25 = arith.constant dense<0.000000e+00> : vector<64x288xf32>
    %101 = tpu.matmul %99, %100, %cst_25 {dimension_numbers = #tpu.dot_dimension_numbers<[1], [0], [0], [1], [0, 0, 1, 1], [], []>} : vector<64x36xbf16>, vector<36x288xbf16>, vector<64x288xf32> -> vector<64x288xf32>
    %c0_26 = arith.constant 0 : index
    %c0_27 = arith.constant 0 : index
    %102 = vector.load %arg8[%c0_26, %c0_27] : memref<36x32xbf16, #tpu.memory_space<vmem>>, vector<36x32xbf16>
    %cst_28 = arith.constant dense<0.000000e+00> : vector<64x32xf32>
    %103 = tpu.matmul %99, %102, %cst_28 {dimension_numbers = #tpu.dot_dimension_numbers<[1], [0], [0], [1], [0, 0, 1, 1], [], []>} : vector<64x36xbf16>, vector<36x32xbf16>, vector<64x32xf32> -> vector<64x32xf32>
    %104 = arith.mulf %101, %89 : vector<64x288xf32>
    %105 = arith.truncf %104 : vector<64x288xf32> to vector<64x288xbf16>
    %c0_29 = arith.constant 0 : index
    %c0_30 = arith.constant 0 : index
    %106 = vector.load %arg9[%c0_29, %c0_30] : memref<288x32xbf16, #tpu.memory_space<vmem>>, vector<288x32xbf16>
    %cst_31 = arith.constant dense<0.000000e+00> : vector<64x32xf32>
    %107 = tpu.matmul %105, %106, %cst_31 {dimension_numbers = #tpu.dot_dimension_numbers<[1], [0], [0], [1], [0, 0, 1, 1], [], []>} : vector<64x288xbf16>, vector<288x32xbf16>, vector<64x32xf32> -> vector<64x32xf32>
    %108 = tpu.reciprocal %103 {approx = true} : vector<64x32xf32> -> vector<64x32xf32>
    %109 = arith.mulf %107, %108 : vector<64x32xf32>
    %110 = arith.truncf %109 : vector<64x32xf32> to vector<64x32xbf16>
    %c0_32 = arith.constant 0 : index
    %c0_33 = arith.constant 0 : index
    %111 = vector.load %arg10[%c0_32, %c0_33] : memref<32x32xbf16, #tpu.memory_space<vmem>>, vector<32x32xbf16>
    %cst_34 = arith.constant dense<0.000000e+00> : vector<64x32xf32>
    %112 = tpu.matmul %110, %111, %cst_34 {dimension_numbers = #tpu.dot_dimension_numbers<[1], [0], [0], [1], [0, 0, 1, 1], [], []>} : vector<64x32xbf16>, vector<32x32xbf16>, vector<64x32xf32> -> vector<64x32xf32>
    %113 = vector.broadcast %3 : vector<1x32xf32> to vector<64x32xf32>
    %114 = arith.addf %112, %113 : vector<64x32xf32>
    %cst_35 = arith.constant 0.000000e+00 : f32
    %115 = vector.broadcast %cst_35 : f32 to vector<64x32xf32>
    %116 = arith.maximumf %114, %115 : vector<64x32xf32>
    %117 = arith.addf %116, %8 : vector<64x32xf32>
    %cst_36 = arith.constant dense<0.000000e+00> : vector<64xf32>
    %118 = vector.multi_reduction <add>, %117, %cst_36 [1] : vector<64x32xf32> to vector<64xf32>
    %119 = vector.shape_cast %118 : vector<64xf32> to vector<64x1xf32>
    %cst_37 = arith.constant 3.200000e+01 : f32
    %120 = vector.broadcast %cst_37 : f32 to vector<64x1xf32>
    %121 = arith.divf %119, %120 : vector<64x1xf32>
    %122 = vector.broadcast %121 : vector<64x1xf32> to vector<64x32xf32>
    %123 = arith.subf %117, %122 : vector<64x32xf32>
    %124 = arith.mulf %123, %123 : vector<64x32xf32>
    %cst_38 = arith.constant dense<0.000000e+00> : vector<64xf32>
    %125 = vector.multi_reduction <add>, %124, %cst_38 [1] : vector<64x32xf32> to vector<64xf32>
    %126 = vector.shape_cast %125 : vector<64xf32> to vector<64x1xf32>
    %cst_39 = arith.constant 3.200000e+01 : f32
    %127 = vector.broadcast %cst_39 : f32 to vector<64x1xf32>
    %128 = arith.divf %126, %127 : vector<64x1xf32>
    %129 = vector.broadcast %121 : vector<64x1xf32> to vector<64x32xf32>
    %130 = arith.subf %117, %129 : vector<64x32xf32>
    %cst_40 = arith.constant 9.99999974E-6 : f32
    %131 = vector.broadcast %cst_40 : f32 to vector<64x1xf32>
    %132 = arith.addf %128, %131 : vector<64x1xf32>
    %133 = math.rsqrt %132 : vector<64x1xf32>
    %134 = vector.broadcast %133 : vector<64x1xf32> to vector<64x32xf32>
    %135 = arith.mulf %130, %134 : vector<64x32xf32>
    %136 = vector.broadcast %1 : vector<1x32xf32> to vector<64x32xf32>
    %137 = arith.mulf %135, %136 : vector<64x32xf32>
    %138 = vector.broadcast %2 : vector<1x32xf32> to vector<64x32xf32>
    %139 = arith.addf %137, %138 : vector<64x32xf32>
    %140 = arith.truncf %139 : vector<64x32xf32> to vector<64x32xbf16>
    %c0_41 = arith.constant 0 : index
    %c0_42 = arith.constant 0 : index
    %141 = vector.load %arg11[%c0_41, %c0_42] : memref<32x32xbf16, #tpu.memory_space<vmem>>, vector<32x32xbf16>
    %cst_43 = arith.constant dense<0.000000e+00> : vector<64x32xf32>
    %142 = tpu.matmul %140, %141, %cst_43 {dimension_numbers = #tpu.dot_dimension_numbers<[1], [0], [0], [1], [0, 0, 1, 1], [], []>} : vector<64x32xbf16>, vector<32x32xbf16>, vector<64x32xf32> -> vector<64x32xf32>
    %143 = vector.broadcast %4 : vector<1x32xf32> to vector<64x32xf32>
    %144 = arith.addf %142, %143 : vector<64x32xf32>
    %cst_44 = arith.constant 0.000000e+00 : f32
    %145 = vector.broadcast %cst_44 : f32 to vector<64x32xf32>
    %146 = arith.maximumf %144, %145 : vector<64x32xf32>
    %147 = arith.truncf %146 : vector<64x32xf32> to vector<64x32xbf16>
    %c0_45 = arith.constant 0 : index
    %c0_46 = arith.constant 0 : index
    %148 = vector.load %arg12[%c0_45, %c0_46] : memref<32x32xbf16, #tpu.memory_space<vmem>>, vector<32x32xbf16>
    %cst_47 = arith.constant dense<0.000000e+00> : vector<64x32xf32>
    %149 = tpu.matmul %147, %148, %cst_47 {dimension_numbers = #tpu.dot_dimension_numbers<[1], [0], [0], [1], [0, 0, 1, 1], [], []>} : vector<64x32xbf16>, vector<32x32xbf16>, vector<64x32xf32> -> vector<64x32xf32>
    %150 = vector.broadcast %5 : vector<1x32xf32> to vector<64x32xf32>
    %151 = arith.addf %149, %150 : vector<64x32xf32>
    %cst_48 = arith.constant 0.000000e+00 : f32
    %152 = vector.broadcast %cst_48 : f32 to vector<64x32xf32>
    %153 = arith.maximumf %151, %152 : vector<64x32xf32>
    %154 = arith.truncf %153 : vector<64x32xf32> to vector<64x32xbf16>
    %c0_49 = arith.constant 0 : index
    %c0_50 = arith.constant 0 : index
    %155 = vector.load %arg13[%c0_49, %c0_50] : memref<32x32xbf16, #tpu.memory_space<vmem>>, vector<32x32xbf16>
    %cst_51 = arith.constant dense<0.000000e+00> : vector<64x32xf32>
    %156 = tpu.matmul %154, %155, %cst_51 {dimension_numbers = #tpu.dot_dimension_numbers<[1], [0], [0], [1], [0, 0, 1, 1], [], []>} : vector<64x32xbf16>, vector<32x32xbf16>, vector<64x32xf32> -> vector<64x32xf32>
    %157 = vector.broadcast %6 : vector<1x32xf32> to vector<64x32xf32>
    %158 = arith.addf %156, %157 : vector<64x32xf32>
    %cst_52 = arith.constant 0.000000e+00 : f32
    %159 = vector.broadcast %cst_52 : f32 to vector<64x32xf32>
    %160 = arith.maximumf %158, %159 : vector<64x32xf32>
    %161 = arith.addf %160, %139 : vector<64x32xf32>
    %162 = vector.shape_cast %161 : vector<64x32xf32> to vector<8x8x32xf32>
    %163 = vector.extract_strided_slice %162 {offsets = [0, 0, 0], sizes = [8, 1, 32], strides = [1, 1, 1]} : vector<8x8x32xf32> to vector<8x1x32xf32>
    %164 = vector.shape_cast %163 : vector<8x1x32xf32> to vector<8x32xf32>
    %165 = vector.extract_strided_slice %162 {offsets = [0, 1, 0], sizes = [8, 1, 32], strides = [1, 1, 1]} : vector<8x8x32xf32> to vector<8x1x32xf32>
    %166 = vector.shape_cast %165 : vector<8x1x32xf32> to vector<8x32xf32>
    %167 = vector.extract_strided_slice %162 {offsets = [0, 2, 0], sizes = [8, 1, 32], strides = [1, 1, 1]} : vector<8x8x32xf32> to vector<8x1x32xf32>
    %168 = vector.shape_cast %167 : vector<8x1x32xf32> to vector<8x32xf32>
    %169 = vector.extract_strided_slice %162 {offsets = [0, 3, 0], sizes = [8, 1, 32], strides = [1, 1, 1]} : vector<8x8x32xf32> to vector<8x1x32xf32>
    %170 = vector.shape_cast %169 : vector<8x1x32xf32> to vector<8x32xf32>
    %171 = vector.extract_strided_slice %162 {offsets = [0, 4, 0], sizes = [8, 1, 32], strides = [1, 1, 1]} : vector<8x8x32xf32> to vector<8x1x32xf32>
    %172 = vector.shape_cast %171 : vector<8x1x32xf32> to vector<8x32xf32>
    %173 = vector.extract_strided_slice %162 {offsets = [0, 5, 0], sizes = [8, 1, 32], strides = [1, 1, 1]} : vector<8x8x32xf32> to vector<8x1x32xf32>
    %174 = vector.shape_cast %173 : vector<8x1x32xf32> to vector<8x32xf32>
    %175 = vector.extract_strided_slice %162 {offsets = [0, 6, 0], sizes = [8, 1, 32], strides = [1, 1, 1]} : vector<8x8x32xf32> to vector<8x1x32xf32>
    %176 = vector.shape_cast %175 : vector<8x1x32xf32> to vector<8x32xf32>
    %177 = vector.extract_strided_slice %162 {offsets = [0, 7, 0], sizes = [8, 1, 32], strides = [1, 1, 1]} : vector<8x8x32xf32> to vector<8x1x32xf32>
    %178 = vector.shape_cast %177 : vector<8x1x32xf32> to vector<8x32xf32>
    %179 = tpu.concatenate %164, %166, %168, %170, %172, %174, %176, %178 in 1 : vector<8x32xf32>, vector<8x32xf32>, vector<8x32xf32>, vector<8x32xf32>, vector<8x32xf32>, vector<8x32xf32>, vector<8x32xf32>, vector<8x32xf32> -> vector<8x256xf32>
    %c0_53 = arith.constant 0 : index
    %c0_54 = arith.constant 0 : index
    %180 = vector.load %arg14[%c0_53, %c0_54] : memref<8x256xf32, #tpu.memory_space<vmem>>, vector<8x256xf32>
    tpu.vector_store %arg14[%c0_53, %c0_54], %179 {strides = array<i32>} : memref<8x256xf32, #tpu.memory_space<vmem>>, vector<8x256xf32>,
    return
  }
  func.func @transform_0(%arg0: i32) -> (i32, i32, i32) {
    %c0_i32 = arith.constant 0 : i32
    %c0_i32_0 = arith.constant 0 : i32
    %c0_i32_1 = arith.constant 0 : i32
    return %arg0, %c0_i32, %c0_i32_0 : i32, i32, i32
  }
  func.func @transform_1(%arg0: i32) -> (i32, i32) {
    %c0_i32 = arith.constant 0 : i32
    %c0_i32_0 = arith.constant 0 : i32
    return %arg0, %c0_i32 : i32, i32
  }
  func.func @transform_2(%arg0: i32) -> (i32, i32) {
    %c0_i32 = arith.constant 0 : i32
    %c0_i32_0 = arith.constant 0 : i32
    %c0_i32_1 = arith.constant 0 : i32
    return %c0_i32, %c0_i32_0 : i32, i32
  }
  func.func @transform_3(%arg0: i32) -> (i32, i32) {
    %c0_i32 = arith.constant 0 : i32
    %c0_i32_0 = arith.constant 0 : i32
    %c0_i32_1 = arith.constant 0 : i32
    return %c0_i32, %c0_i32_0 : i32, i32
  }
  func.func @transform_4(%arg0: i32) -> (i32, i32) {
    %c0_i32 = arith.constant 0 : i32
    %c0_i32_0 = arith.constant 0 : i32
    %c0_i32_1 = arith.constant 0 : i32
    return %c0_i32, %c0_i32_0 : i32, i32
  }
  func.func @transform_5(%arg0: i32) -> (i32, i32) {
    %c0_i32 = arith.constant 0 : i32
    %c0_i32_0 = arith.constant 0 : i32
    %c0_i32_1 = arith.constant 0 : i32
    return %c0_i32, %c0_i32_0 : i32, i32
  }
  func.func @transform_6(%arg0: i32) -> (i32, i32) {
    %c0_i32 = arith.constant 0 : i32
    %c0_i32_0 = arith.constant 0 : i32
    %c0_i32_1 = arith.constant 0 : i32
    return %c0_i32, %c0_i32_0 : i32, i32
  }
  func.func @transform_7(%arg0: i32) -> (i32, i32) {
    %c0_i32 = arith.constant 0 : i32
    %c0_i32_0 = arith.constant 0 : i32
    %c0_i32_1 = arith.constant 0 : i32
    return %c0_i32, %c0_i32_0 : i32, i32
  }
  func.func @transform_8(%arg0: i32) -> (i32, i32) {
    %c0_i32 = arith.constant 0 : i32
    %c0_i32_0 = arith.constant 0 : i32
    %c0_i32_1 = arith.constant 0 : i32
    return %c0_i32, %c0_i32_0 : i32, i32
  }
  func.func @transform_9(%arg0: i32) -> (i32, i32) {
    %c0_i32 = arith.constant 0 : i32
    %c0_i32_0 = arith.constant 0 : i32
    %c0_i32_1 = arith.constant 0 : i32
    return %c0_i32, %c0_i32_0 : i32, i32
  }
  func.func @transform_10(%arg0: i32) -> (i32, i32) {
    %c0_i32 = arith.constant 0 : i32
    %c0_i32_0 = arith.constant 0 : i32
    %c0_i32_1 = arith.constant 0 : i32
    return %c0_i32, %c0_i32_0 : i32, i32
  }
  func.func @transform_11(%arg0: i32) -> (i32, i32) {
    %c0_i32 = arith.constant 0 : i32
    %c0_i32_0 = arith.constant 0 : i32
    %c0_i32_1 = arith.constant 0 : i32
    return %c0_i32, %c0_i32_0 : i32, i32
  }
  func.func @transform_12(%arg0: i32) -> (i32, i32) {
    %c0_i32 = arith.constant 0 : i32
    %c0_i32_0 = arith.constant 0 : i32
    %c0_i32_1 = arith.constant 0 : i32
    return %c0_i32, %c0_i32_0 : i32, i32
  }
  func.func @transform_13(%arg0: i32) -> (i32, i32) {
    %c0_i32 = arith.constant 0 : i32
    %c0_i32_0 = arith.constant 0 : i32
    return %arg0, %c0_i32 : i32, i32
  }
}

</mosaic_0001>

<bundles_post_ra>
// kernel: tpu_custom_call.1
= control target key start
LH: loop header
LB: loop body
LE: loop exit
PB: predicated region body
PF: predicated region fallthrough
CT: control target
= control target key end

     0   :  { %vm56_vm0 = vcmask 261120   ;;  %s3998_s0 = inlined_call_operand.vmem [shape: f32[8,8,32], index: 0, kind: input, shape index: {}]   ;;  %s3999_s1 = inlined_call_operand.vmem [shape: f32[8,32], index: 1, kind: input, shape index: {}]   ;;  %s4000_s2 = inlined_call_operand.vmem [shape: f32[8,32], index: 2, kind: input, shape index: {}]   ;;  %s4001_s3 = inlined_call_operand.vmem [shape: bf16[32,288], index: 3, kind: input, shape index: {}]   ;;  %s4002_s4 = inlined_call_operand.vmem [shape: bf16[32,64], index: 4, kind: input, shape index: {}]   ;;  %s4003_s5 = inlined_call_operand.vmem [shape: bf16[288,36], index: 5, kind: input, shape index: {}]   ;;  %s4004_s6 = inlined_call_operand.vmem [shape: bf16[36,288], index: 6, kind: input, shape index: {}]   ;;  %s4005_s7 = inlined_call_operand.vmem [shape: bf16[36,32], index: 7, kind: input, shape index: {}]   ;;  %s4006_s8 = inlined_call_operand.vmem [shape: bf16[288,32], index: 8, kind: input, shape index: {}]   ;;  %s4007_s9 = inlined_call_operand.vmem [shape: bf16[32,32], index: 9, kind: input, shape index: {}]   ;;  %s4008_s10 = inlined_call_operand.vmem [shape: bf16[32,32], index: 10, kind: input, shape index: {}]   ;;  %s4009_s11 = inlined_call_operand.vmem [shape: bf16[32,32], index: 11, kind: input, shape index: {}]   ;;  %s4010_s12 = inlined_call_operand.vmem [shape: bf16[32,32], index: 12, kind: input, shape index: {}]   ;;  %s4011_s13 = inlined_call_operand.hbm [shape: f32[8,256], index: 13, kind: output, shape index: {}]  }
   0x1   :  { %v53_v0 = vld [vmem:[%s3998_s0 + $0x30] sm:$0xff]  ;;  %v51_v1 = vld [vmem:[%s3998_s0 + $0x20] sm:$0xff] }
   0x2   :  { %v47_v2 = vld [vmem:[%s3998_s0] sm:$0xff]  ;;  %v75_v3 = vsel %vm56_vm0, %v53_v0, 0.0  ;;  %v69_v4 = vsel %vm56_vm0, %v51_v1, 0.0 }
   0x3   :  { %v57_v5 = vsel %vm56_vm0, %v47_v2, 0.0  ;;  %76 = vadd.xlane.f32.xlu1 %v75_v3  ;;  %70 = vadd.xlane.f32.xlu0 %v69_v4 }
   0x4   :  { %18 = vsyncpa [#allocation3], 0  ;;  %58 = vadd.xlane.f32.xlu2 %v57_v5  ;;  %v54_v6 = vld [vmem:[%s3998_s0 + $0x38] sm:$0xff]  ;;  %v52_v7 = vld [vmem:[%s3998_s0 + $0x28] sm:$0xff]  ;;  %v2763_v14 = vmov 32.0   ;;  %s2764_s21 = smov 64  }
   0x5   :  { %v48_v8 = vld [vmem:[%s3998_s0 + $0x8] sm:$0xff]  ;;  %v78_v9 = vsel %vm56_vm0, %v54_v6, 0.0  ;;  %v72_v10 = vsel %vm56_vm0, %v52_v7, 0.0  ;;  %v49_v12 = vld [vmem:[%s3998_s0 + $0x10] sm:$0xff]  ;;  %2662 = vrcp.f32 %v2763_v14  ;;  %v50_v35 = vld [vmem:[%s3998_s0 + $0x18] sm:$0xff]  ;;  %s2765_s22 = smov 32  }
   0x6   :  { %v60_v11 = vsel %vm56_vm0, %v48_v8, 0.0  ;;  %v63_v13 = vsel %vm56_vm0, %v49_v12, 0.0  ;;  %v66_v38 = vsel %vm56_vm0, %v50_v35, 0.0  ;;  %v2596_v58 = vld [vmem:[%s4001_s3 + $0x1c] sm:$0xf]  ;;  %s2766_s23 = smov 96  }
   0x7   :  { %v2312_v59 = vld [vmem:[%s4001_s3 + $0x24] sm:$0xf0]  ;;  %v2318_v60 = vld [vmem:[%s4001_s3 + $0x20] sm:$0xf]  ;;  %v2598_v63 = vld [vmem:[%s4001_s3 + $0x28] sm:$0xf0] }
   0x8   :  { %v2315_v62 = vor.u32 %v2596_v58, %v2312_v59  ;;  %v2593_v3 = vld [vmem:[%s4001_s3 + $0x4] sm:$0xf]  ;;  %v2300_v4 = vld [vmem:[%s4001_s3 + $0xc] sm:$0xf0]  ;;  %s2287_s20 = sshll.u32 %s4011_s13, 4  ;;  %s2288_s20 = int_to_ptr.hbm [resolvable:$true] %s2287_s20 }
   0x9   :  { %v2303_v5 = vor.u32 %v2593_v3, %v2300_v4  ;;  %v2988_v59 = vld [vmem:[%s4002_s4] sm:$0xff] }
   0xa   :  { %2653 = vmatpush.bf16.msra.mxu3 %v2315_v62  ;;  %349 = vmatpush.bf16.msra.mxu1 %v2315_v62 }
   0xb   :  { %79 = vadd.xlane.f32.xlu1 %v78_v9  ;;  %73 = vadd.xlane.f32.xlu0 %v72_v10  ;;  %v2663_v15 = vpop.eup %2662 }
   0xc   :  { %61 = vadd.xlane.f32.xlu2 %v60_v11  ;;  %v82_v16 = vmul.f32 32.0, %v2663_v15  ;;  %vm86_vm1 = vweird.f32 %v2663_v15 }
   0xe   :  { %v83_v17 = vsub.f32 1.0, %v82_v16  ;;  %2654 = vmatpush.bf16.msra.mxu3 %v2303_v5  ;;  %350 = vmatpush.bf16.msra.mxu1 %v2303_v5 }
  0x10   :  { %v84_v18 = vmul.f32 %v2663_v15, %v83_v17 }
  0x12   :  { %v85_v19 = vadd.f32 %v2663_v15, %v84_v18 }
  0x14   :  { %64 = vadd.xlane.f32.xlu2 %v63_v13  ;;  %v2866_v20 = vsel %vm86_vm1, %v2663_v15, %v85_v19 }
  0x76   :  { %v77_v21 = vpop.xlane.xlu1 %76  ;;  %v71_v22 = vpop.xlane.xlu0 %70 }
  0x77   :  { %v92_v23 = vmul.f32 %v2866_v20, %v71_v22  ;;  %v59_v24 = vpop.xlane.xlu2 %58  ;;  %v94_v30 = vmul.f32 %v2866_v20, %v77_v21 }
  0x78   :  { %v88_v31 = vmul.f32 %v2866_v20, %v59_v24  ;;  %v2310_v24 = vld [vmem:[%s4001_s3 + $0x18] sm:$0xf] }
  0x79   :  { %v2869_v25 = vsub.f32 %v51_v1, %v92_v23  ;;  %v2886_v39 = vsub.f32 %v53_v0, %v94_v30  ;;  %v2319_v1 = vor.u32 %v2598_v63, %v2318_v60 }
  0x7a   :  { %v2888_v40 = vsub.f32 %v47_v2, %v88_v31  ;;  %v2298_v31 = vld [vmem:[%s4001_s3] sm:$0xf] }
  0x7b   :  { %v108_v26 = vmul.f32 %v2869_v25, %v2869_v25  ;;  %v110_v47 = vmul.f32 %v2886_v39, %v2886_v39  ;;  %2655 = vmatpush.bf16.msra.mxu2 %v2319_v1 }
  0x7c   :  { %v104_v48 = vmul.f32 %v2888_v40, %v2888_v40 }
  0x7d   :  { %v124_v27 = vsel %vm56_vm0, %v108_v26, 0.0  ;;  %v130_v52 = vsel %vm56_vm0, %v110_v47, 0.0  ;;  %v2597_v26 = vld [vmem:[%s4001_s3 + $0x20] sm:$0xf0] }
  0x7e   :  { %v80_v28 = vpop.xlane.xlu1 %79  ;;  %125 = vadd.xlane.f32.xlu0 %v124_v27  ;;  %v74_v29 = vpop.xlane.xlu0 %73  ;;  %v112_v53 = vsel %vm56_vm0, %v104_v48, 0.0  ;;  %v2311_v30 = vor.u32 %v2597_v26, %v2310_v24 }
  0x7f   :  { %v95_v32 = vmul.f32 %v2866_v20, %v80_v28  ;;  %v93_v33 = vmul.f32 %v2866_v20, %v74_v29  ;;  %v62_v34 = vpop.xlane.xlu2 %61 }
  0x80   :  { %v89_v45 = vmul.f32 %v2866_v20, %v62_v34  ;;  %320 = vmatpush.bf16.msra.mxu0 %v2311_v30 }
  0x81   :  { %v2881_v36 = vsub.f32 %v54_v6, %v95_v32  ;;  %v2883_v37 = vsub.f32 %v52_v7, %v93_v33  ;;  %v2306_v6 = vld [vmem:[%s4001_s3 + $0x8] sm:$0xf]  ;;  %v2595_v7 = vld [vmem:[%s4001_s3 + $0x10] sm:$0xf0]  ;;  %v2594_v32 = vld [vmem:[%s4001_s3 + $0x8] sm:$0xf0] }
  0x82   :  { %v2904_v51 = vsub.f32 %v48_v8, %v89_v45  ;;  %v2939_v8 = vor.u32 %v2595_v7, %v2306_v6 }
  0x83   :  { %v109_v41 = vmul.f32 %v2883_v37, %v2883_v37  ;;  %v111_v42 = vmul.f32 %v2881_v36, %v2881_v36 }
  0x84   :  { %v105_v56 = vmul.f32 %v2904_v51, %v2904_v51  ;;  %2656 = vmatpush.bf16.msra.mxu2 %v2939_v8 }
  0x85   :  { %v127_v43 = vsel %vm56_vm0, %v109_v41, 0.0  ;;  %v133_v44 = vsel %vm56_vm0, %v111_v42, 0.0 }
  0x86   :  { %128 = vadd.xlane.f32.xlu1 %v127_v43  ;;  %67 = vadd.xlane.f32.xlu0 %v66_v38  ;;  %v115_v57 = vsel %vm56_vm0, %v105_v56, 0.0  ;;  %v2299_v38 = vor.u32 %v2594_v32, %v2298_v31 }
  0x87   :  { %134 = vadd.xlane.f32.xlu2 %v133_v44  ;;  %v65_v46 = vpop.xlane.xlu2 %64 }
  0x88   :  { %v90_v49 = vmul.f32 %v2866_v20, %v65_v46  ;;  %321 = vmatpush.bf16.msra.mxu0 %v2299_v38 }
  0x8a   :  { %v2902_v50 = vsub.f32 %v49_v12, %v90_v49 }
  0x8c   :  { %v106_v54 = vmul.f32 %v2902_v50, %v2902_v50  ;;  %378 = vmatpush.bf16.msrb.mxu0 %v2319_v1 }
  0x8e   :  { %131 = vadd.xlane.f32.xlu1 %v130_v52  ;;  %113 = vadd.xlane.f32.xlu0 %v112_v53  ;;  %v118_v55 = vsel %vm56_vm0, %v106_v54, 0.0  ;;  %v46_v54 = vld [vmem:[%s4000_s2] sm:$0xff] }
  0x8f   :  { %119 = vadd.xlane.f32.xlu2 %v118_v55  ;;  %v2980_v55 = vld [vmem:[%s4002_s4 + $0x8] sm:$0xff]  ;;  %v2991_v63 = vperm.slane %v46_v54, 0 }
  0x90   :  { %423 = vmatpush.bf16.msrb.mxu3 %v2980_v55  ;;  %379 = vmatpush.bf16.msrb.mxu0 %v2939_v8 }
  0x94   :  { %424 = vmatpush.bf16.msrb.mxu3 %v2988_v59 }
  0x96   :  { %116 = vadd.xlane.f32.xlu1 %v115_v57 }
  0xf1   :  { %v126_v61 = vpop.xlane.xlu0 %125 }
  0xf2   :  { %v140_v0 = vmul.f32 %v126_v61, %v2866_v20 }
  0xf4   :  { %v148_v2 = vadd.f32 1e-05, %v140_v0 }
  0xf6   :  { %2664 = vrsqrt.f32 %v148_v2  ;;  %vm198_vm3 = vweird.f32 %v148_v2 }
  0xf9   :  { %v129_v9 = vpop.xlane.xlu1 %128  ;;  %v68_v10 = vpop.xlane.xlu0 %67 }
  0xfa   :  { %v141_v11 = vmul.f32 %v129_v9, %v2866_v20  ;;  %v91_v12 = vmul.f32 %v2866_v20, %v68_v10  ;;  %v135_v13 = vpop.xlane.xlu2 %134  ;;  %v2998_v10 = vperm.slane %v46_v54, 1 }
  0xfb   :  { %v143_v14 = vmul.f32 %v135_v13, %v2866_v20 }
  0xfc   :  { %v2665_v15 = vpop.eup %2664  ;;  %v149_v16 = vadd.f32 1e-05, %v141_v11  ;;  %v2945_v17 = vsub.f32 %v50_v35, %v91_v12 }
  0xfd   :  { %v193_v18 = vmul.f32 %v2665_v15, %v148_v2  ;;  %v2947_v19 = vadd.f32 1e-05, %v143_v14  ;;  %vm199_vm2 = vweird.f32 %v2665_v15 }
  0xfe   :  { %2666 = vrsqrt.f32 %v149_v16  ;;  %v107_v21 = vmul.f32 %v2945_v17, %v2945_v17  ;;  %vm200_vm4 = vmor %vm198_vm3, %vm199_vm2  ;;  %vm208_vm5 = vweird.f32 %v149_v16 }
  0xff   :  { %v194_v22 = vmul.f32 %v2665_v15, %v193_v18  ;;  %2668 = vrsqrt.f32 %v2947_v19  ;;  %vm228_vm10 = vweird.f32 %v2947_v19 }
 0x100   :  { %v121_v23 = vsel %vm56_vm0, %v107_v21, 0.0 }
 0x101   :  { %v195_v27 = vmul.f32 0.5, %v194_v22  ;;  %v132_v28 = vpop.xlane.xlu1 %131  ;;  %122 = vadd.xlane.f32.xlu0 %v121_v23  ;;  %v114_v29 = vpop.xlane.xlu0 %113  ;;  %v55_v22 = vld [vmem:[%s3999_s1] sm:$0xff] }
 0x102   :  { %v142_v33 = vmul.f32 %v132_v28, %v2866_v20  ;;  %v136_v34 = vmul.f32 %v114_v29, %v2866_v20 }
 0x103   :  { %v196_v35 = vsub.f32 1.5, %v195_v27 }
 0x104   :  { %v2667_v41 = vpop.eup %2666  ;;  %v150_v42 = vadd.f32 1e-05, %v142_v33  ;;  %v2967_v43 = vadd.f32 1e-05, %v136_v34 }
 0x105   :  { %v2969_v44 = vpop.eup %2668  ;;  %v197_v45 = vmul.f32 %v2665_v15, %v196_v35  ;;  %v203_v46 = vmul.f32 %v2667_v41, %v149_v16  ;;  %vm209_vm6 = vweird.f32 %v2667_v41 }
 0x106   :  { %v223_v47 = vmul.f32 %v2969_v44, %v2947_v19  ;;  %2670 = vrsqrt.f32 %v150_v42  ;;  %vm210_vm7 = vmor %vm208_vm5, %vm209_vm6  ;;  %vm218_vm8 = vweird.f32 %v150_v42  ;;  %vm158_vm11 = vweird.f32 %v2967_v43 }
 0x107   :  { %v204_v48 = vmul.f32 %v2667_v41, %v203_v46  ;;  %2672 = vrsqrt.f32 %v2967_v43  ;;  %v201_v49 = vsel %vm200_vm4, %v2665_v15, %v197_v45  ;;  %vm229_vm13 = vweird.f32 %v2969_v44 }
 0x108   :  { %v224_v56 = vmul.f32 %v2969_v44, %v223_v47  ;;  %v236_v61 = vmul.f32 %v201_v49, %v2869_v25  ;;  %vm230_vm1 = vmor %vm228_vm10, %vm229_vm13  ;;  %vm481_vm13 = vcmask 1044484  }
 0x109   :  { %v205_v52 = vmul.f32 0.5, %v204_v48  ;;  %v117_v53 = vpop.xlane.xlu1 %116 }
 0x10a   :  { %v137_v57 = vmul.f32 %v117_v53, %v2866_v20  ;;  %v225_v3 = vmul.f32 0.5, %v224_v56  ;;  %v245_v9 = vmul.f32 %v2991_v63, %v236_v61 }
 0x10b   :  { %v206_v58 = vsub.f32 1.5, %v205_v52 }
 0x10c   :  { %v2671_v60 = vpop.eup %2670  ;;  %v145_v62 = vadd.f32 1e-05, %v137_v57  ;;  %v226_v8 = vsub.f32 1.5, %v225_v3  ;;  %v254_v16 = vadd.f32 %v2998_v10, %v245_v9 }
 0x10d   :  { %v2673_v0 = vpop.eup %2672  ;;  %v207_v1 = vmul.f32 %v2667_v41, %v206_v58  ;;  %v213_v2 = vmul.f32 %v2671_v60, %v150_v42  ;;  %vm219_vm9 = vweird.f32 %v2671_v60 }
 0x10e   :  { %v153_v4 = vmul.f32 %v2673_v0, %v2967_v43  ;;  %2674 = vrsqrt.f32 %v145_v62  ;;  %vm159_vm12 = vweird.f32 %v2673_v0  ;;  %vm3007_vm14 = vmor %vm218_vm8, %vm219_vm9  ;;  %v227_v24 = vmul.f32 %v2969_v44, %v226_v8 }
 0x10f   :  { %v211_v5 = vsel %vm210_vm7, %v2667_v41, %v207_v1  ;;  %v214_v6 = vmul.f32 %v2671_v60, %v213_v2  ;;  %vm160_vm15 = vmor %vm158_vm11, %vm159_vm12  ;;  %vm168_vm2 = vweird.f32 %v145_v62  ;;  %vm472_vm11 = vcmask 1041409  }
 0x110   :  { %v237_v7 = vmul.f32 %v211_v5, %v2883_v37  ;;  %v154_v25 = vmul.f32 %v2673_v0, %v153_v4  ;;  %v231_v32 = vsel %vm230_vm1, %v2969_v44, %v227_v24  ;;  %vm475_vm12 = vcmask 1042434  }
 0x111   :  { %v215_v11 = vmul.f32 0.5, %v214_v6  ;;  %v239_v35 = vmul.f32 %v231_v32, %v2881_v36  ;;  %vm487_vm1 = vcmask 1046534  }
 0x112   :  { %v155_v12 = vmul.f32 0.5, %v154_v25  ;;  %v246_v13 = vmul.f32 %v2991_v63, %v237_v7 }
 0x113   :  { %v216_v14 = vsub.f32 1.5, %v215_v11  ;;  %v248_v46 = vmul.f32 %v2991_v63, %v239_v35 }
 0x114   :  { %v2675_v15 = vpop.eup %2674  ;;  %v156_v37 = vsub.f32 1.5, %v155_v12  ;;  %v255_v18 = vadd.f32 %v2998_v10, %v246_v13 }
 0x115   :  { %v217_v21 = vmul.f32 %v2671_v60, %v216_v14  ;;  %v163_v23 = vmul.f32 %v2675_v15, %v145_v62  ;;  %vm169_vm3 = vweird.f32 %v2675_v15  ;;  %v257_v36 = vadd.f32 %v2998_v10, %v248_v46 }
 0x116   :  { %v157_v26 = vmul.f32 %v2673_v0, %v156_v37  ;;  %v3012_v27 = vpack.c.bf16 %v255_v18, %v254_v16  ;;  %vm170_vm4 = vmor %vm168_vm2, %vm169_vm3  ;;  %vm4012_vm2 = vcmask 1047559   ;;  %vm611_vm3 = vcmask 523264  }
 0x117   :  { %v164_v28 = vmul.f32 %v2675_v15, %v163_v23  ;;  %v221_v29 = vsel %vm3007_vm14, %v2671_v60, %v217_v21  ;;  %vm478_vm14 = vcmask 1043459  }
 0x118   :  { %2326 = vmatmul.msk.bf16.vlgmr.msra.gmra.mxu3 %vm56_vm0, %v3012_v27  ;;  %2330 = vmatmul.msk.bf16.vlgmr.msra.gmra.mxu2 %vm56_vm0, %v3012_v27  ;;  %v161_v30 = vsel %vm160_vm15, %v2673_v0, %v157_v26  ;;  %v238_v33 = vmul.f32 %v221_v29, %v2886_v39  ;;  %v446_v26 = vpack.c.bf16 %v55_v22, %v55_v22  ;;  %vm4013_vm15 = vcmask 1045509  }
 0x119   :  { %v165_v31 = vmul.f32 0.5, %v164_v28  ;;  %v232_v34 = vmul.f32 %v161_v30, %v2888_v40 }
 0x11a   :  { %v247_v42 = vmul.f32 %v2991_v63, %v238_v33 }
 0x11b   :  { %v166_v19 = vsub.f32 1.5, %v165_v31  ;;  %v241_v45 = vmul.f32 %v2991_v63, %v232_v34 }
 0x11c   :  { %v256_v39 = vadd.f32 %v2998_v10, %v247_v42 }
 0x11d   :  { %v167_v38 = vmul.f32 %v2675_v15, %v166_v19  ;;  %v250_v47 = vadd.f32 %v2998_v10, %v241_v45 }
 0x11e   :  { %v261_v49 = vpack.c.bf16 %v257_v36, %v256_v39 }
 0x11f   :  { %v171_v41 = vsel %vm170_vm4, %v2675_v15, %v167_v38  ;;  %vm613_vm4 = vcmask 785408  }
 0x120   :  { %v233_v43 = vmul.f32 %v171_v41, %v2904_v51  ;;  %v120_v51 = vpop.xlane.xlu2 %119 }
 0x121   :  { %v138_v52 = vmul.f32 %v120_v51, %v2866_v20 }
 0x122   :  { %v242_v44 = vmul.f32 %v2991_v63, %v233_v43 }
 0x123   :  { %v146_v53 = vadd.f32 1e-05, %v138_v52 }
 0x124   :  { %v251_v40 = vadd.f32 %v2998_v10, %v242_v44 }
 0x125   :  { %2676 = vrsqrt.f32 %v146_v53  ;;  %vm178_vm5 = vweird.f32 %v146_v53 }
 0x126   :  { %v258_v48 = vpack.c.bf16 %v251_v40, %v250_v47 }
 0x128   :  { %2320 = vmatmul.msk.bf16.vlgmr.msra.gmra.mxu0 %vm56_vm0, %v258_v48  ;;  %2324 = vmatmul.msk.bf16.vlgmr.msra.gmra.mxu1 %vm56_vm0, %v258_v48 }
 0x129   :  { %2327 = vmatmul.msk.bf16.gmra.mxu3 %vm56_vm0, %v261_v49  ;;  %2331 = vmatmul.msk.bf16.gmra.mxu2 %vm56_vm0, %v261_v49 }
 0x12a   :  { %456 = vmatpush.bf16.msra.mxu0 %v2980_v55 }
 0x12b   :  { %v2677_v54 = vpop.eup %2676 }
 0x12c   :  { %v173_v56 = vmul.f32 %v2677_v54, %v146_v53  ;;  %vm179_vm6 = vweird.f32 %v2677_v54 }
 0x12d   :  { %vm180_vm7 = vmor %vm178_vm5, %vm179_vm6  ;;  %vm651_vm5 = vcmask 1040384   ;;  %vm653_vm6 = vcmask 1041408  }
 0x12e   :  { %457 = vmatpush.bf16.msra.mxu0 %v2988_v59  ;;  %v174_v57 = vmul.f32 %v2677_v54, %v173_v56 }
 0x130   :  { %v175_v62 = vmul.f32 0.5, %v174_v57 }
 0x132   :  { %v176_v0 = vsub.f32 1.5, %v175_v62 }
 0x134   :  { %v177_v59 = vmul.f32 %v2677_v54, %v176_v0 }
 0x136   :  { %v181_v3 = vsel %vm180_vm7, %v2677_v54, %v177_v59  ;;  %vm656_vm7 = vcmask 1042433  }
 0x137   :  { %v234_v6 = vmul.f32 %v181_v3, %v2902_v50 }
 0x139   :  { %2340 = vmatmul.msk.bf16.vlgmr.msrb.gmra.mxu3 %vm56_vm0, %v258_v48  ;;  %v243_v11 = vmul.f32 %v2991_v63, %v234_v6 }
 0x13b   :  { %v252_v12 = vadd.f32 %v2998_v10, %v243_v11 }
 0x174   :  { %v123_v58 = vpop.xlane.xlu0 %122 }
 0x175   :  { %v139_v60 = vmul.f32 %v123_v58, %v2866_v20 }
 0x177   :  { %v147_v61 = vadd.f32 1e-05, %v139_v60 }
 0x179   :  { %2678 = vrsqrt.f32 %v147_v61  ;;  %vm188_vm9 = vweird.f32 %v147_v61 }
 0x17f   :  { %v2679_v55 = vpop.eup %2678 }
 0x180   :  { %v183_v1 = vmul.f32 %v2679_v55, %v147_v61  ;;  %vm189_vm8 = vweird.f32 %v2679_v55 }
 0x181   :  { %vm190_vm10 = vmor %vm188_vm9, %vm189_vm8  ;;  %vm660_vm8 = vcmask 1043458   ;;  %vm664_vm9 = vcmask 1044483  }
 0x182   :  { %v184_v2 = vmul.f32 %v2679_v55, %v183_v1 }
 0x184   :  { %v185_v4 = vmul.f32 0.5, %v184_v2 }
 0x186   :  { %v186_v5 = vsub.f32 1.5, %v185_v4 }
 0x188   :  { %v187_v7 = vmul.f32 %v2679_v55, %v186_v5 }
 0x18a   :  { %v191_v25 = vsel %vm190_vm10, %v2679_v55, %v187_v7  ;;  %vm4015_vm10 = vcmask 1045508  }
 0x18b   :  { %v235_v9 = vmul.f32 %v191_v25, %v2945_v17 }
 0x18d   :  { %v244_v8 = vmul.f32 %v2991_v63, %v235_v9  ;;  %v2618_v9 = vld [vmem:[%s4003_s5 + $0x88] sm:$0xff] }
 0x18e   :  { %1063 = vmatpush.bf16.msra.mxu3 %v2618_v9 }
 0x18f   :  { %v253_v13 = vadd.f32 %v2998_v10, %v244_v8 }
 0x191   :  { %v259_v14 = vpack.c.bf16 %v253_v13, %v252_v12 }
 0x193   :  { %2321 = vmatmul.msk.bf16.gmra.mxu0 %vm56_vm0, %v259_v14  ;;  %2325 = vmatmul.msk.bf16.gmra.mxu1 %vm56_vm0, %v259_v14 }
 0x194   :  { %2341 = vmatmul.msk.bf16.gmra.mxu3 %vm56_vm0, %v259_v14 }
 0x19b   :  { %v3061_v50 = vpop.f32.mrf.mxu3 }
 0x1a3   :  { %2322 = vmatmul.msk.bf16.gmra.mxu0 %vm56_vm0, %v3012_v27  ;;  %v3063_v17 = vpop.f32.mrf.mxu3 }
 0x1a4   :  { %2342 = vmatmul.msk.bf16.gmra.mxu3 %vm56_vm0, %v3012_v27 }
 0x1a5   :  { %v3091_v34 = vpop.f32.mrf.mxu0 }
 0x1ac   :  { %v3065_v15 = vpop.f32.mrf.mxu3 }
 0x1ad   :  { %v3103_v39 = vpop.f32.mrf.mxu0 }
 0x1b3   :  { %2323 = vmatmul.msk.bf16.gmra.mxu0 %vm56_vm0, %v261_v49 }
 0x1b4   :  { %2343 = vmatmul.msk.bf16.gmra.mxu3 %vm56_vm0, %v261_v49  ;;  %v3067_v37 = vpop.f32.mrf.mxu3 }
 0x1bc   :  { %v3069_v16 = vpop.f32.mrf.mxu3 }
 0x1bd   :  { %v544_v27 = vrot.slane %v3069_v16, 4  ;;  %v576_v49 = vrot.slane %v3069_v16, 6  ;;  %v493_v51 = vrot.slane %v3069_v16, 1  ;;  %v559_v53 = vrot.slane %v3069_v16, 5 }
 0x1be   :  { %v593_v54 = vrot.slane %v3069_v16, 7  ;;  %v510_v56 = vrot.slane %v3069_v16, 2  ;;  %v527_v60 = vrot.slane %v3069_v16, 3 }
 0x1c3   :  { %2328 = vmatmul.msk.bf16.vlgmr.msrb.gmra.mxu0 %vm56_vm0, %v258_v48 }
 0x1c4   :  { %v3071_v18 = vpop.f32.mrf.mxu3 }
 0x1c5   :  { %v545_v23 = vrot.slane %v3071_v18, 3  ;;  %v471_v24 = vrot.slane %v3071_v18, 7  ;;  %v577_v40 = vrot.slane %v3071_v18, 5  ;;  %v560_v36 = vrot.slane %v3071_v18, 4 }
 0x1c6   :  { %v594_v48 = vrot.slane %v3071_v18, 6  ;;  %v511_v52 = vrot.slane %v3071_v18, 1  ;;  %v494_v58 = vsel %vm472_vm11, %v3071_v18, %v493_v51  ;;  %v528_v61 = vrot.slane %v3071_v18, 2 }
 0x1c7   :  { %v546_v30 = vsel %vm472_vm11, %v545_v23, %v544_v27  ;;  %v473_v31 = vsel %vm472_vm11, %v471_v24, %v3069_v16  ;;  %v578_v57 = vsel %vm472_vm11, %v577_v40, %v576_v49  ;;  %v561_v0 = vsel %vm472_vm11, %v560_v36, %v559_v53 }
 0x1c8   :  { %v3125_v55 = vsel %vm472_vm11, %v594_v48, %v593_v54  ;;  %v512_v4 = vsel %vm472_vm11, %v511_v52, %v510_v56 }
 0x1d3   :  { %2329 = vmatmul.msk.bf16.gmra.mxu0 %vm56_vm0, %v259_v14 }
 0x1e3   :  { %2344 = vmatmul.msk.bf16.vlgmr.msra.gmra.mxu0 %vm56_vm0, %v446_v26 }
 0x210   :  { %v3121_v62 = vpop.f32.mrf.mxu0 }
 0x217   :  { %v3073_v21 = vpop.f32.mrf.mxu3 }
 0x218   :  { %v547_v28 = vrot.slane %v3073_v21, 2  ;;  %v474_v29 = vrot.slane %v3073_v21, 6  ;;  %v579_v3 = vrot.slane %v3073_v21, 4  ;;  %v562_v6 = vrot.slane %v3073_v21, 3  ;;  %v3174_v52 = vpop.f32.mrf.mxu0 }
 0x219   :  { %v495_v7 = vrot.slane %v3073_v21, 7  ;;  %v596_v25 = vrot.slane %v3073_v21, 5  ;;  %v530_v40 = vrot.slane %v3073_v21, 1 }
 0x21a   :  { %v548_v32 = vsel %vm475_vm12, %v547_v28, %v546_v30  ;;  %v476_v33 = vsel %vm475_vm12, %v474_v29, %v473_v31  ;;  %v580_v30 = vsel %vm475_vm12, %v579_v3, %v578_v57  ;;  %v563_v31 = vsel %vm475_vm12, %v562_v6, %v561_v0 }
 0x21f   :  { %v3089_v19 = vpop.f32.mrf.mxu3 }
 0x220   :  { %v549_v35 = vrot.slane %v3089_v19, 1  ;;  %v477_v38 = vrot.slane %v3089_v19, 5  ;;  %v581_v5 = vrot.slane %v3089_v19, 3  ;;  %v564_v11 = vrot.slane %v3089_v19, 2 }
 0x221   :  { %v497_v8 = vrot.slane %v3089_v19, 6 }
 0x222   :  { %v550_v42 = vsel %vm478_vm14, %v549_v35, %v548_v32  ;;  %v479_v46 = vsel %vm478_vm14, %v477_v38, %v476_v33  ;;  %v496_v32 = vsel %vm475_vm12, %v495_v7, %v494_v58  ;;  %v582_v35 = vsel %vm478_vm14, %v581_v5, %v580_v30 }
 0x223   :  { %v565_v38 = vsel %vm478_vm14, %v564_v11, %v563_v31  ;;  %v514_v7 = vrot.slane %v3089_v19, 7  ;;  %v513_v11 = vsel %vm475_vm12, %v3073_v21, %v512_v4 }
 0x227   :  { %v3095_v41 = vpop.f32.mrf.mxu3 }
 0x228   :  { %v551_v43 = vsel %vm481_vm13, %v3095_v41, %v550_v42  ;;  %v480_v45 = vrot.slane %v3095_v41, 4  ;;  %v583_v14 = vrot.slane %v3095_v41, 2  ;;  %v566_v22 = vrot.slane %v3095_v41, 1 }
 0x229   :  { %v499_v27 = vrot.slane %v3095_v41, 5  ;;  %v600_v9 = vrot.slane %v3095_v41, 3  ;;  %v533_v21 = vrot.slane %v3095_v41, 7 }
 0x22a   :  { %v482_v44 = vsel %vm481_vm13, %v480_v45, %v479_v46  ;;  %v584_v45 = vsel %vm481_vm13, %v583_v14, %v582_v35  ;;  %v567_v46 = vsel %vm481_vm13, %v566_v22, %v565_v38  ;;  %v3234_v35 = vpop.f32.mrf.mxu0 }
 0x22f   :  { %v3105_v47 = vpop.f32.mrf.mxu3 }
 0x230   :  { %v552_v59 = vrot.slane %v3105_v47, 7  ;;  %v483_v1 = vrot.slane %v3105_v47, 3  ;;  %v585_v26 = vrot.slane %v3105_v47, 1  ;;  %v501_v33 = vrot.slane %v3105_v47, 4 }
 0x231   :  { %v568_v49 = vsel %vm4013_vm15, %v3105_v47, %v567_v46  ;;  %v602_v14 = vrot.slane %v3105_v47, 2  ;;  %v518_v22 = vrot.slane %v3105_v47, 5 }
 0x232   :  { %v553_v23 = vsel %vm4013_vm15, %v552_v59, %v551_v43  ;;  %v485_v24 = vsel %vm4013_vm15, %v483_v1, %v482_v44  ;;  %v498_v44 = vsel %vm478_vm14, %v497_v8, %v496_v32  ;;  %v586_v48 = vsel %vm4013_vm15, %v585_v26, %v584_v45  ;;  %v3253_v45 = vpop.f32.mrf.mxu0 }
 0x233   :  { %v500_v51 = vsel %vm481_vm13, %v499_v27, %v498_v44  ;;  %v598_v1 = vrot.slane %v3089_v19, 4  ;;  %v516_v8 = vrot.slane %v3095_v41, 6 }
 0x234   :  { %v502_v56 = vsel %vm4013_vm15, %v501_v33, %v500_v51  ;;  %v2608_v51 = vld [vmem:[%s4003_s5 + $0x38] sm:$0xff] }
 0x235   :  { %999 = vmatpush.bf16.msrb.mxu1 %v2608_v51 }
 0x237   :  { %v3129_v2 = vpop.f32.mrf.mxu3 }
 0x238   :  { %v554_v12 = vrot.slane %v3129_v2, 6  ;;  %v486_v13 = vrot.slane %v3129_v2, 2  ;;  %v569_v42 = vrot.slane %v3129_v2, 7  ;;  %v503_v43 = vrot.slane %v3129_v2, 3 }
 0x239   :  { %v587_v58 = vsel %vm487_vm1, %v3129_v2, %v586_v48  ;;  %v604_v4 = vrot.slane %v3129_v2, 1  ;;  %v520_v16 = vrot.slane %v3129_v2, 4 }
 0x23a   :  { %v3151_v28 = vsel %vm487_vm1, %v554_v12, %v553_v23  ;;  %v3154_v29 = vsel %vm487_vm1, %v486_v13, %v485_v24  ;;  %v570_v0 = vsel %vm487_vm1, %v569_v42, %v568_v49  ;;  %v504_v59 = vsel %vm487_vm1, %v503_v43, %v502_v56  ;;  %v3255_v46 = vpop.f32.mrf.mxu0  ;;  %v2616_v49 = vld [vmem:[%s4003_s5 + $0x78] sm:$0xff]  ;;  %v2615_v56 = vld [vmem:[%s4003_s5 + $0x70] sm:$0xff] }
 0x23b   :  { %v529_v12 = vsel %vm472_vm11, %v528_v61, %v527_v60  ;;  %v597_v13 = vsel %vm475_vm12, %v596_v25, %v3125_v55  ;;  %v535_v60 = vrot.slane %v3105_v47, 6  ;;  %v515_v23 = vsel %vm478_vm14, %v514_v7, %v513_v11  ;;  %1028 = vmatpush.bf16.msrb.mxu2 %v2616_v49  ;;  %v2605_v7 = vld [vmem:[%s4003_s5 + $0x20] sm:$0xff]  ;;  %v2612_v11 = vld [vmem:[%s4003_s5 + $0x58] sm:$0xff] }
 0x23c   :  { %v531_v18 = vsel %vm475_vm12, %v530_v40, %v529_v12  ;;  %v599_v61 = vsel %vm478_vm14, %v598_v1, %v597_v13  ;;  %v537_v25 = vrot.slane %v3129_v2, 5  ;;  %v517_v41 = vsel %vm481_vm13, %v516_v8, %v515_v23  ;;  %v2613_v1 = vld [vmem:[%s4003_s5 + $0x60] sm:$0xff]  ;;  %v2604_v8 = vld [vmem:[%s4003_s5 + $0x18] sm:$0xff]  ;;  %v2611_v12 = vld [vmem:[%s4003_s5 + $0x50] sm:$0xff] }
 0x23d   :  { %v601_v24 = vsel %vm481_vm13, %v600_v9, %v599_v61  ;;  %v532_v26 = vsel %vm478_vm14, %v3089_v19, %v531_v18  ;;  %v519_v47 = vsel %vm4013_vm15, %v518_v22, %v517_v41  ;;  %v2603_v13 = vld [vmem:[%s4003_s5 + $0x10] sm:$0xff]  ;;  %v2610_v22 = vld [vmem:[%s4003_s5 + $0x48] sm:$0xff] }
 0x23e   :  { %v603_v30 = vsel %vm4013_vm15, %v602_v14, %v601_v24  ;;  %v534_v31 = vsel %vm481_vm13, %v533_v21, %v532_v26  ;;  %v521_v33 = vsel %vm487_vm1, %v520_v16, %v519_v47  ;;  %v2602_v21 = vld [vmem:[%s4003_s5 + $0x8] sm:$0xff]  ;;  %v2601_v16 = vld [vmem:[%s4003_s5] sm:$0xff]  ;;  %v352_v24 = vpop.f32.mrf.mxu1 }
 0x23f   :  { %v3168_v36 = vpop.f32.mrf.mxu3  ;;  %v605_v32 = vsel %vm487_vm1, %v604_v4, %v603_v30  ;;  %v536_v2 = vsel %vm4013_vm15, %v535_v60, %v534_v31  ;;  %1029 = vmatpush.bf16.msrb.mxu2 %v2615_v56  ;;  %v2609_v4 = vld [vmem:[%s4003_s5 + $0x40] sm:$0xff] }
 0x240   :  { %v588_v53 = vrot.slane %v3168_v36, 7  ;;  %v571_v54 = vrot.slane %v3168_v36, 6  ;;  %v505_v57 = vrot.slane %v3168_v36, 2  ;;  %v522_v55 = vrot.slane %v3168_v36, 3 }
 0x241   :  { %v539_v27 = vrot.slane %v3168_v36, 4  ;;  %v3238_v38 = vsel %vm4012_vm2, %v3168_v36, %v605_v32  ;;  %v538_v42 = vsel %vm487_vm1, %v537_v25, %v536_v2  ;;  %v556_v60 = vrot.slane %v3168_v36, 5 }
 0x242   :  { %v3186_v3 = vsel %vm4012_vm2, %v588_v53, %v587_v58  ;;  %v3189_v5 = vsel %vm4012_vm2, %v571_v54, %v570_v0  ;;  %v3192_v6 = vsel %vm4012_vm2, %v505_v57, %v504_v59  ;;  %v3241_v19 = vsel %vm4012_vm2, %v522_v55, %v521_v33  ;;  %v3257_v44 = vpop.f32.mrf.mxu0  ;;  %v2617_v53 = vld [vmem:[%s4003_s5 + $0x80] sm:$0xff]  ;;  %v2607_v57 = vld [vmem:[%s4003_s5 + $0x30] sm:$0xff]  ;;  %v2614_v58 = vld [vmem:[%s4003_s5 + $0x68] sm:$0xff] }
 0x243   :  { %590 = vrot.lane.b32.xlu2 %v3186_v3, %s2764_s21  ;;  %573 = vrot.lane.b32.xlu1 %v3189_v5, %s2765_s22  ;;  %v3249_v43 = vsel %vm4012_vm2, %v539_v27, %v538_v42  ;;  %v2606_v0 = vld [vmem:[%s4003_s5 + $0x28] sm:$0xff]  ;;  %v3323_v23 = vsel %vm4012_vm2, %v556_v60, %v3151_v28  ;;  %v489_v26 = vrot.slane %v3168_v36, 1 }
 0x244   :  { %507 = vrot.lane.b32.xlu0 %v3192_v6, %s2765_s22  ;;  %1064 = vmatpush.bf16.msra.mxu3 %v2617_v53 }
 0x245   :  { %1000 = vmatpush.bf16.msrb.mxu1 %v2607_v57  ;;  %1030 = vmatpush.bf16.msrb.mxu2 %v2614_v58  ;;  %v3332_v47 = vsel %vm4012_vm2, %v489_v26, %v3154_v29  ;;  %vm4014_vm2 = vcmask 1046533  }
 0x246   :  { %v354_v51 = vpop.f32.mrf.mxu1 }
 0x249   :  { %1001 = vmatpush.bf16.msrb.mxu1 %v2606_v0  ;;  %1031 = vmatpush.bf16.msrb.mxu2 %v2613_v1 }
 0x24a   :  { %v3259_v40 = vpop.f32.mrf.mxu0 }
 0x24b   :  { %607 = vrot.lane.b32.xlu2 %v3238_v38, %s2766_s23  ;;  %524 = vrot.lane.b32.xlu1 %v3241_v19, %s2764_s21 }
 0x24c   :  { %541 = vrot.lane.b32.xlu0 %v3249_v43, %s2766_s23 }
 0x24d   :  { %1002 = vmatpush.bf16.msrb.mxu1 %v2605_v7  ;;  %1032 = vmatpush.bf16.msrb.mxu2 %v2612_v11 }
 0x251   :  { %1003 = vmatpush.bf16.msrb.mxu1 %v2604_v8  ;;  %1033 = vmatpush.bf16.msrb.mxu2 %v2611_v12 }
 0x252   :  { %v3261_v48 = vpop.f32.mrf.mxu0 }
 0x255   :  { %1004 = vmatpush.bf16.msrb.mxu1 %v2603_v13  ;;  %1034 = vmatpush.bf16.msrb.mxu2 %v2610_v22 }
 0x259   :  { %1005 = vmatpush.bf16.msrb.mxu1 %v2602_v21  ;;  %1035 = vmatpush.bf16.msrb.mxu2 %v2609_v4 }
 0x25a   :  { %v3272_v54 = vpop.f32.mrf.mxu0 }
 0x25d   :  { %1006 = vmatpush.bf16.msrb.mxu1 %v2601_v16 }
 0x262   :  { %v3286_v59 = vpop.f32.mrf.mxu0 }
 0x26a   :  { %v3294_v9 = vpop.f32.mrf.mxu0 }
 0x26b   :  { %v3337_v31 = vrot.slane %v3294_v9, 6 }
 0x272   :  { %v461_v14 = vpop.f32.mrf.mxu0 }
 0x29d   :  { %v591_v18 = vpop.permute.xlu2 %590 }
 0x2a5   :  { %v608_v27 = vpop.permute.xlu2 %607 }
 0x2b5   :  { %v574_v61 = vpop.permute.xlu1 %573 }
 0x2b6   :  { %v615_v55 = vsel %vm56_vm0, %v3323_v23, %v574_v61  ;;  %v508_v25 = vpop.permute.xlu0 %507 }
 0x2b7   :  { %v616_v41 = vsel %vm611_vm3, %v615_v55, %v591_v18  ;;  %v610_v28 = vsel %vm56_vm0, %v3332_v47, %v508_v25  ;;  %v357_v55 = vpop.f32.mrf.mxu1 }
 0x2b8   :  { %v617_v30 = vsel %vm613_vm4, %v616_v41, %v608_v27 }
 0x2b9   :  { %v3339_v33 = vrot.slane %v617_v30, 7 }
 0x2bd   :  { %v525_v32 = vpop.permute.xlu1 %524 }
 0x2be   :  { %v612_v2 = vsel %vm611_vm3, %v610_v28, %v525_v32  ;;  %v542_v36 = vpop.permute.xlu0 %541 }
 0x2bf   :  { %v3343_v42 = vsel %vm613_vm4, %v612_v2, %v542_v36  ;;  %v359_v32 = vpop.f32.mrf.mxu1 }
 0x2c0   :  { %v652_v29 = vsel %vm651_vm5, %v3343_v42, %v3339_v33  ;;  %v655_v49 = vsel %vm472_vm11, %v3343_v42, %v3339_v33  ;;  %v659_v12 = vsel %vm475_vm12, %v3343_v42, %v3339_v33  ;;  %v663_v13 = vsel %vm478_vm14, %v3343_v42, %v3339_v33 }
 0x2c1   :  { %v654_v53 = vsel %vm653_vm6, %v652_v29, %v3337_v31  ;;  %v657_v56 = vsel %vm656_vm7, %v655_v49, %v3337_v31  ;;  %v661_v41 = vsel %vm660_vm8, %v659_v12, %v3337_v31  ;;  %v665_v26 = vsel %vm664_vm9, %v663_v13, %v3337_v31 }
 0x2c2   :  { %v658_v57 = vrot.slane %v657_v56, 1  ;;  %v684_v58 = vperm.slane %v654_v53, 0  ;;  %v685_v0 = vperm.slane %v654_v53, 1  ;;  %v686_v1 = vperm.slane %v654_v53, 2  ;;  %v391_v56 = vpop.f32.mrf.mxu2 }
 0x2c4   :  { %v687_v7 = vperm.slane %v658_v57, 0  ;;  %v688_v11 = vperm.slane %v658_v57, 1  ;;  %v689_v8 = vperm.slane %v658_v57, 2  ;;  %v807_v14 = vmul.f32 %v684_v58, %v3091_v34 }
 0x2c5   :  { %v808_v21 = vmul.f32 %v685_v0, %v352_v24  ;;  %v809_v16 = vmul.f32 %v686_v1, %v3259_v40  ;;  %v662_v34 = vrot.slane %v661_v41, 2  ;;  %v667_v57 = vsel %vm481_vm13, %v3343_v42, %v3339_v33 }
 0x2c6   :  { %v810_v22 = vmul.f32 %v687_v7, %v3103_v39  ;;  %v811_v4 = vmul.f32 %v688_v11, %v354_v51  ;;  %v812_v18 = vmul.f32 %v689_v8, %v3261_v48  ;;  %v666_v39 = vrot.slane %v665_v26, 3 }
 0x2c7   :  { %v690_v24 = vperm.slane %v662_v34, 0  ;;  %v691_v27 = vperm.slane %v662_v34, 1  ;;  %v692_v30 = vperm.slane %v662_v34, 2  ;;  %v671_v58 = vsel %vm4013_vm15, %v3343_v42, %v3339_v33 }
 0x2c8   :  { %v831_v60 = vpack.c.bf16 %v810_v22, %v807_v14  ;;  %v832_v61 = vpack.c.bf16 %v811_v4, %v808_v21  ;;  %v833_v25 = vpack.c.bf16 %v812_v18, %v809_v16  ;;  %v693_v40 = vperm.slane %v666_v39, 0 }
 0x2c9   :  { %v694_v48 = vperm.slane %v666_v39, 1  ;;  %v695_v28 = vperm.slane %v666_v39, 2  ;;  %v813_v2 = vmul.f32 %v690_v24, %v3121_v62  ;;  %v814_v29 = vmul.f32 %v691_v27, %v357_v55 }
 0x2ca   :  { %1007 = vmatmul.bf16.vlgmr.msrb.gmra.mxu1 %v831_v60  ;;  %1036 = vmatmul.bf16.vlgmr.msrb.gmra.mxu2 %v832_v61  ;;  %v816_v36 = vmul.f32 %v693_v40, %v3174_v52  ;;  %v815_v51 = vmul.f32 %v692_v30, %v3272_v54  ;;  %v669_v1 = vsel %vm4015_vm10, %v667_v57, %v3337_v31  ;;  %v393_v11 = vpop.f32.mrf.mxu2  ;;  %vm679_vm15 = vcmask 1046528  }
 0x2cb   :  { %2417 = vmatmul.msk.bf16.vlgmr.msra.gmra.mxu3 %vm56_vm0, %v833_v25  ;;  %v817_v49 = vmul.f32 %v694_v48, %v359_v32  ;;  %v818_v53 = vmul.f32 %v695_v28, %v3286_v59  ;;  %v673_v54 = vsel %vm4014_vm2, %v671_v58, %v3337_v31  ;;  %v670_v59 = vrot.slane %v669_v1, 4 }
 0x2cc   :  { %v834_v62 = vpack.c.bf16 %v816_v36, %v813_v2  ;;  %v674_v7 = vrot.slane %v673_v54, 5  ;;  %v675_v25 = vsel %vm487_vm1, %v3343_v42, %v3339_v33  ;;  %vm676_vm2 = vcmask 1045504  }
 0x2cd   :  { %v835_v0 = vpack.c.bf16 %v817_v49, %v814_v29  ;;  %v836_v52 = vpack.c.bf16 %v818_v53, %v815_v51  ;;  %v696_v8 = vperm.slane %v670_v59, 0  ;;  %v697_v13 = vperm.slane %v670_v59, 1 }
 0x2ce   :  { %v699_v12 = vperm.slane %v674_v7, 0  ;;  %v700_v14 = vperm.slane %v674_v7, 1  ;;  %v698_v22 = vperm.slane %v670_v59, 2  ;;  %v701_v21 = vperm.slane %v674_v7, 2 }
 0x2cf   :  { %v819_v4 = vmul.f32 %v696_v8, %v3234_v35  ;;  %v820_v18 = vmul.f32 %v697_v13, %v3061_v50  ;;  %v680_v41 = vsel %vm679_vm15, %v3339_v33, %v3343_v42  ;;  %vm4016_vm10 = vcmask 1046529  }
 0x2d0   :  { %v822_v16 = vmul.f32 %v699_v12, %v3253_v45  ;;  %v823_v60 = vmul.f32 %v700_v14, %v3063_v17  ;;  %v821_v61 = vmul.f32 %v698_v22, %v391_v56  ;;  %v824_v55 = vmul.f32 %v701_v21, %v393_v11 }
 0x2d1   :  { %v677_v50 = vsel %vm676_vm2, %v3337_v31, %v675_v25  ;;  %v682_v17 = vsel %vm4016_vm10, %v3337_v31, %v680_v41  ;;  %vm1086_vm10 = vcmask 293888  }
 0x2d2   :  { %v837_v26 = vpack.c.bf16 %v822_v16, %v819_v4  ;;  %v838_v35 = vpack.c.bf16 %v823_v60, %v820_v18  ;;  %v839_v34 = vpack.c.bf16 %v824_v55, %v821_v61  ;;  %v396_v45 = vpop.f32.mrf.mxu2  ;;  %v678_v39 = vrot.slane %v677_v50, 6 }
 0x2d3   :  { %v683_v24 = vrot.slane %v682_v17, 7 }
 0x2d4   :  { %v702_v40 = vperm.slane %v678_v39, 0  ;;  %v703_v33 = vperm.slane %v678_v39, 1  ;;  %v704_v48 = vperm.slane %v678_v39, 2 }
 0x2d5   :  { %v705_v27 = vperm.slane %v683_v24, 0  ;;  %v706_v42 = vperm.slane %v683_v24, 1  ;;  %v707_v30 = vperm.slane %v683_v24, 2 }
 0x2d6   :  { %v825_v32 = vmul.f32 %v702_v40, %v3255_v46  ;;  %v826_v31 = vmul.f32 %v703_v33, %v3065_v15  ;;  %v827_v29 = vmul.f32 %v704_v48, %v396_v45 }
 0x2d7   :  { %v828_v2 = vmul.f32 %v705_v27, %v3257_v44  ;;  %v829_v36 = vmul.f32 %v706_v42, %v3067_v37  ;;  %v1148_v27 = vld [vmem:[%s4004_s6 + $0x38] sm:$0x3] }
 0x2d8   :  { %v1173_v33 = vunpack.c.l.b16 %v1148_v27 }
 0x2d9   :  { %v840_v51 = vpack.c.bf16 %v828_v2, %v825_v32  ;;  %v841_v53 = vpack.c.bf16 %v829_v36, %v826_v31  ;;  %v1147_v36 = vld [vmem:[%s4004_s6 + $0x30] sm:$0x33] }
 0x2da   :  { %1012 = vmatmul.bf16.gmra.mxu1 %v834_v62  ;;  %1041 = vmatmul.bf16.gmra.mxu2 %v835_v0  ;;  %v398_v28 = vpop.f32.mrf.mxu2 }
 0x2db   :  { %2418 = vmatmul.msk.bf16.gmra.mxu3 %vm56_vm0, %v836_v52  ;;  %v830_v49 = vmul.f32 %v707_v30, %v398_v28  ;;  %v1182_v28 = vpack.c.b16 %v1173_v33, %v1173_v33 }
 0x2dd   :  { %v842_v56 = vpack.c.bf16 %v830_v49, %v827_v29  ;;  %v1208_v2 = vsel %vm653_vm6, %v1182_v28, 0 }
 0x2de   :  { %1273 = vmatpush.bf16.msra.mxu2 %v1208_v2 }
 0x2ea   :  { %1017 = vmatmul.bf16.gmra.mxu1 %v837_v26  ;;  %1046 = vmatmul.bf16.gmra.mxu2 %v838_v35 }
 0x2eb   :  { %2419 = vmatmul.msk.bf16.gmra.mxu3 %vm56_vm0, %v839_v34 }
 0x2fa   :  { %1022 = vmatmul.bf16.gmra.mxu1 %v840_v51  ;;  %1051 = vmatmul.bf16.gmra.mxu2 %v841_v53  ;;  %v1172_v51 = vunpack.c.h.b16 %v1147_v36 }
 0x2fb   :  { %2420 = vmatmul.msk.bf16.gmra.mxu3 %vm56_vm0, %v842_v56 }
 0x347   :  { %v1008_v57 = vpop.f32.mrf.mxu1 }
 0x34d   :  { %v1037_v58 = vpop.f32.mrf.mxu2 }
 0x34e   :  { %v1038_v62 = vadd.f32 %v1037_v58, %v1008_v57  ;;  %v1066_v0 = vpop.f32.mrf.mxu3  ;;  %v1181_v57 = vpack.c.b16 %v1172_v51, %v1172_v51 }
 0x34f   :  { %v1010_v46 = vpop.f32.mrf.mxu1 }
 0x350   :  { %v3405_v44 = vadd.f32 %v1066_v0, %v1038_v62  ;;  %v1205_v62 = vsel %vm653_vm6, %v1181_v57, 0 }
 0x351   :  { %1244 = vmatpush.bf16.msra.mxu1 %v1205_v62 }
 0x352   :  { %v1087_v15 = vsel %vm1086_vm10, %v3405_v44, -inf }
 0x353   :  { %1088 = vmax.xlane.f32.xlu2 %v1087_v15  ;;  %v2624_v15 = vld [vmem:[%s4004_s6 + $0x28] sm:$0xf0] }
 0x355   :  { %v1039_v37 = vpop.f32.mrf.mxu2 }
 0x356   :  { %v1040_v52 = vadd.f32 %v1039_v37, %v1010_v46  ;;  %v1068_v1 = vpop.f32.mrf.mxu3  ;;  %v2443_v46 = vld [vmem:[%s4004_s6 + $0x20] sm:$0xf]  ;;  %v2622_v37 = vld [vmem:[%s4004_s6 + $0x1c] sm:$0xf] }
 0x357   :  { %v1013_v54 = vpop.f32.mrf.mxu1 }
 0x358   :  { %v3409_v59 = vadd.f32 %v1068_v1, %v1040_v52  ;;  %v2444_v52 = vor.u32 %v2624_v15, %v2443_v46  ;;  %v2437_v1 = vld [vmem:[%s4004_s6 + $0x24] sm:$0xf0] }
 0x35a   :  { %v1090_v7 = vsel %vm1086_vm10, %v3409_v59, -inf  ;;  %1274 = vmatpush.bf16.msra.mxu2 %v2444_v52  ;;  %v2642_v52 = vld [vmem:[%s4006_s8 + $0x78] sm:$0xff] }
 0x35b   :  { %1091 = vmax.xlane.f32.xlu1 %v1090_v7  ;;  %v1301_v7 = vld [vmem:[%s4005_s7 + $0x10] sm:$0x3] }
 0x35d   :  { %v1042_v11 = vpop.f32.mrf.mxu2 }
 0x35e   :  { %v1043_v8 = vadd.f32 %v1042_v11, %v1013_v54  ;;  %v1071_v12 = vpop.f32.mrf.mxu3  ;;  %v2440_v54 = vor.u32 %v2622_v37, %v2437_v1  ;;  %v2644_v37 = vld [vmem:[%s4006_s8 + $0x88] sm:$0xff] }
 0x35f   :  { %v1015_v13 = vpop.f32.mrf.mxu1 }
 0x360   :  { %v3413_v14 = vadd.f32 %v1071_v12, %v1043_v8  ;;  %1245 = vmatpush.bf16.msra.mxu1 %v2440_v54  ;;  %v1311_v8 = vunpack.c.l.b16 %v1301_v7  ;;  %v2633_v54 = vld [vmem:[%s4006_s8 + $0x30] sm:$0xff]  ;;  %v2631_v7 = vld [vmem:[%s4006_s8 + $0x20] sm:$0xff] }
 0x362   :  { %v1093_v22 = vsel %vm1086_vm10, %v3413_v14, -inf }
 0x363   :  { %1094 = vmax.xlane.f32.xlu0 %v1093_v22  ;;  %v1314_v22 = vpack.c.b16 %v1311_v8, %v1311_v8  ;;  %v2630_v8 = vld [vmem:[%s4006_s8 + $0x18] sm:$0xff] }
 0x365   :  { %v1044_v21 = vpop.f32.mrf.mxu2 }
 0x366   :  { %v1045_v4 = vadd.f32 %v1044_v21, %v1015_v13  ;;  %v1073_v16 = vpop.f32.mrf.mxu3  ;;  %v2623_v13 = vld [vmem:[%s4004_s6 + $0x20] sm:$0xf0] }
 0x367   :  { %v1018_v18 = vpop.f32.mrf.mxu1 }
 0x368   :  { %v3417_v60 = vadd.f32 %v1073_v16, %v1045_v4  ;;  %v1318_v4 = vsel %vm653_vm6, %v1314_v22, 0 }
 0x369   :  { %1325 = vmatpush.bf16.msrb.mxu3 %v1318_v4  ;;  %v2636_v4 = vld [vmem:[%s4006_s8 + $0x48] sm:$0xff] }
 0x36a   :  { %v1096_v61 = vsel %vm1086_vm10, %v3417_v60, -inf }
 0x36b   :  { %1097 = vmax.xlane.f32.xlu2 %v1096_v61  ;;  %v2423_v61 = vld [vmem:[%s4004_s6] sm:$0xf] }
 0x36d   :  { %v1047_v55 = vpop.f32.mrf.mxu2 }
 0x36e   :  { %v1048_v25 = vadd.f32 %v1047_v55, %v1018_v18  ;;  %v1076_v41 = vpop.f32.mrf.mxu3  ;;  %v2626_v18 = vld [vmem:[%s4005_s7 + $0x8] sm:$0xff] }
 0x36f   :  { %v1020_v35 = vpop.f32.mrf.mxu1  ;;  %v2620_v55 = vld [vmem:[%s4004_s6 + $0x8] sm:$0xf0]  ;;  %1326 = vmatpush.bf16.msrb.mxu3 %v2626_v18  ;;  %v2635_v18 = vld [vmem:[%s4006_s8 + $0x40] sm:$0xff] }
 0x370   :  { %v3421_v26 = vadd.f32 %v1076_v41, %v1048_v25  ;;  %v2424_v25 = vor.u32 %v2620_v55, %v2423_v61  ;;  %v2625_v41 = vld [vmem:[%s4005_s7] sm:$0xff] }
 0x372   :  { %v1099_v34 = vsel %vm1086_vm10, %v3421_v26, -inf }
 0x373   :  { %1100 = vmax.xlane.f32.xlu1 %v1099_v34  ;;  %1327 = vmatpush.bf16.msrb.mxu3 %v2625_v41 }
 0x375   :  { %v1049_v50 = vpop.f32.mrf.mxu2 }
 0x376   :  { %v1050_v17 = vadd.f32 %v1049_v50, %v1020_v35  ;;  %v1078_v45 = vpop.f32.mrf.mxu3 }
 0x377   :  { %v1023_v40 = vpop.f32.mrf.mxu1 }
 0x378   :  { %v3425_v39 = vadd.f32 %v1078_v45, %v1050_v17 }
 0x37a   :  { %v1102_v24 = vsel %vm1086_vm10, %v3425_v39, -inf }
 0x37b   :  { %1103 = vmax.xlane.f32.xlu0 %v1102_v24 }
 0x37d   :  { %v1052_v42 = vpop.f32.mrf.mxu2 }
 0x37e   :  { %v1053_v48 = vadd.f32 %v1052_v42, %v1023_v40  ;;  %v1081_v30 = vpop.f32.mrf.mxu3 }
 0x37f   :  { %v1025_v29 = vpop.f32.mrf.mxu1 }
 0x380   :  { %v3432_v32 = vadd.f32 %v1081_v30, %v1053_v48 }
 0x382   :  { %v1105_v31 = vsel %vm1086_vm10, %v3432_v32, -inf }
 0x383   :  { %1106 = vmax.xlane.f32.xlu2 %v1105_v31 }
 0x385   :  { %v1054_v49 = vpop.f32.mrf.mxu2 }
 0x386   :  { %v1055_v53 = vadd.f32 %v1054_v49, %v1025_v29  ;;  %v1083_v56 = vpop.f32.mrf.mxu3 }
 0x388   :  { %v3440_v58 = vadd.f32 %v1083_v56, %v1055_v53 }
 0x38a   :  { %v1108_v0 = vsel %vm1086_vm10, %v3440_v58, -inf }
 0x38b   :  { %1109 = vmax.xlane.f32.xlu1 %v1108_v0 }
 0x38f   :  { %628 = vrot.lane.b32.xlu0 %v3323_v23, %s2766_s23  ;;  %v2431_v23 = vld [vmem:[%s4004_s6 + $0x8] sm:$0xf] }
 0x397   :  { %635 = vrot.lane.b32.xlu0 %v3238_v38, %s2764_s21  ;;  %v2621_v38 = vld [vmem:[%s4004_s6 + $0x10] sm:$0xf0] }
 0x39b   :  { %632 = vrot.lane.b32.xlu2 %v3186_v3, %s2765_s22  ;;  %v2432_v3 = vor.u32 %v2621_v38, %v2431_v23  ;;  %v2643_v23 = vld [vmem:[%s4006_s8 + $0x80] sm:$0xff]  ;;  %v2632_v38 = vld [vmem:[%s4006_s8 + $0x28] sm:$0xff] }
 0x39d   :  { %1275 = vmatpush.bf16.msra.mxu2 %v2432_v3  ;;  %v2640_v3 = vld [vmem:[%s4006_s8 + $0x68] sm:$0xff] }
 0x39f   :  { %625 = vrot.lane.b32.xlu0 %v3249_v43, %s2764_s21  ;;  %v1171_v43 = vunpack.c.l.b16 %v1147_v36 }
 0x3a1   :  { %v1180_v12 = vpack.c.b16 %v1171_v43, %v1171_v43  ;;  %1605 = vmatpush.bf16.msrb.mxu2 %v2644_v37 }
 0x3a3   :  { %622 = vrot.lane.b32.xlu2 %v3241_v19, %s2765_s22  ;;  %v2619_v19 = vld [vmem:[%s4004_s6 + $0x4] sm:$0xf]  ;;  %v1202_v21 = vsel %vm653_vm6, %v1180_v12, 0  ;;  %v2638_v12 = vld [vmem:[%s4006_s8 + $0x58] sm:$0xff] }
 0x3a4   :  { %618 = vrot.lane.b32.xlu1 %v3332_v47, %s2766_s23  ;;  %v2425_v47 = vld [vmem:[%s4004_s6 + $0xc] sm:$0xf0]  ;;  %1215 = vmatpush.bf16.msrb.mxu0 %v1202_v21  ;;  %v2628_v21 = vld [vmem:[%s4006_s8 + $0x8] sm:$0xff] }
 0x3a5   :  { %v2428_v11 = vor.u32 %v2619_v19, %v2425_v47  ;;  %1606 = vmatpush.bf16.msrb.mxu2 %v2643_v23 }
 0x3a7   :  { %1246 = vmatpush.bf16.msra.mxu1 %v2428_v11  ;;  %v2639_v11 = vld [vmem:[%s4006_s8 + $0x60] sm:$0xff] }
 0x3ab   :  { %1570 = vmatpush.bf16.msrb.mxu1 %v2642_v52 }
 0x3ac   :  { %645 = vrot.lane.b32.xlu1 %v3294_v9, %s2766_s23  ;;  %v2435_v9 = vld [vmem:[%s4004_s6 + $0x18] sm:$0xf] }
 0x3ad   :  { %v2436_v16 = vor.u32 %v2623_v13, %v2435_v9  ;;  %v2629_v9 = vld [vmem:[%s4006_s8 + $0x10] sm:$0xff] }
 0x3ae   :  { %v2637_v13 = vld [vmem:[%s4006_s8 + $0x50] sm:$0xff] }
 0x3af   :  { %1216 = vmatpush.bf16.msrb.mxu0 %v2436_v16  ;;  %v2627_v16 = vld [vmem:[%s4006_s8] sm:$0xff] }
 0x3b3   :  { %1217 = vmatpush.bf16.msrb.mxu0 %v2424_v25 }
 0x3c6   :  { %v1089_v35 = vpop.xlane.xlu2 %1088 }
 0x3c7   :  { %v1111_v34 = vsub.f32 %v3405_v44, %v1089_v35 }
 0x3c9   :  { %v1119_v50 = vmul.f32 1.442695, %v1111_v34 }
 0x3cb   :  { %2680 = vpow2.f32 %v1119_v50 }
 0x3ce   :  { %v1092_v17 = vpop.xlane.xlu1 %1091 }
 0x3cf   :  { %v1112_v45 = vsub.f32 %v3409_v59, %v1092_v17 }
 0x3d1   :  { %v1121_v24 = vmul.f32 1.442695, %v1112_v45  ;;  %v2681_v27 = vpop.eup %2680 }
 0x3d3   :  { %2682 = vpow2.f32 %v1121_v24 }
 0x3d6   :  { %v1095_v40 = vpop.xlane.xlu0 %1094 }
 0x3d7   :  { %v1113_v48 = vsub.f32 %v3413_v14, %v1095_v40 }
 0x3d9   :  { %v2683_v33 = vpop.eup %2682  ;;  %v1123_v44 = vmul.f32 1.442695, %v1113_v48 }
 0x3da   :  { %v1135_v42 = vpack.c.bf16 %v2683_v33, %v2681_v27 }
 0x3db   :  { %2684 = vpow2.f32 %v1123_v44 }
 0x3dc   :  { %2445 = vmatmul.msk.bf16.vlgmr.msrb.gmra.mxu0 %vm1086_vm10, %v1135_v42  ;;  %2449 = vmatmul.msk.bf16.vlgmr.msra.gmra.mxu1 %vm1086_vm10, %v1135_v42 }
 0x3dd   :  { %2453 = vmatmul.msk.bf16.vlgmr.msra.gmra.mxu2 %vm1086_vm10, %v1135_v42  ;;  %2465 = vmatmul.msk.bf16.vlgmr.msrb.gmra.mxu3 %vm1086_vm10, %v1135_v42 }
 0x3de   :  { %v1098_v30 = vpop.xlane.xlu2 %1097 }
 0x3df   :  { %v1114_v59 = vsub.f32 %v3417_v60, %v1098_v30 }
 0x3e1   :  { %v1125_v28 = vmul.f32 1.442695, %v1114_v59  ;;  %v2685_v31 = vpop.eup %2684 }
 0x3e3   :  { %2686 = vpow2.f32 %v1125_v28 }
 0x3e6   :  { %v1101_v2 = vpop.xlane.xlu1 %1100 }
 0x3e7   :  { %v1115_v14 = vsub.f32 %v3421_v26, %v1101_v2 }
 0x3e9   :  { %v2687_v36 = vpop.eup %2686  ;;  %v1127_v49 = vmul.f32 1.442695, %v1115_v14 }
 0x3ea   :  { %v1136_v29 = vpack.c.bf16 %v2687_v36, %v2685_v31 }
 0x3eb   :  { %2688 = vpow2.f32 %v1127_v49 }
 0x3ec   :  { %2446 = vmatmul.msk.bf16.gmra.mxu0 %vm1086_vm10, %v1136_v29  ;;  %2450 = vmatmul.msk.bf16.gmra.mxu1 %vm1086_vm10, %v1136_v29 }
 0x3ed   :  { %2454 = vmatmul.msk.bf16.gmra.mxu2 %vm1086_vm10, %v1136_v29  ;;  %2466 = vmatmul.msk.bf16.gmra.mxu3 %vm1086_vm10, %v1136_v29 }
 0x3ee   :  { %v1104_v51 = vpop.xlane.xlu0 %1103 }
 0x3ef   :  { %v1116_v60 = vsub.f32 %v3425_v39, %v1104_v51 }
 0x3f1   :  { %v1129_v53 = vmul.f32 1.442695, %v1116_v60  ;;  %v2689_v57 = vpop.eup %2688 }
 0x3f3   :  { %2690 = vpow2.f32 %v1129_v53 }
 0x3f6   :  { %v1107_v56 = vpop.xlane.xlu2 %1106 }
 0x3f7   :  { %v1117_v26 = vsub.f32 %v3432_v32, %v1107_v56  ;;  %v2634_v32 = vld [vmem:[%s4006_s8 + $0x38] sm:$0xff] }
 0x3f8   :  { %1541 = vmatpush.bf16.msra.mxu0 %v2634_v32 }
 0x3f9   :  { %v2691_v62 = vpop.eup %2690  ;;  %v1131_v46 = vmul.f32 1.442695, %v1117_v26 }
 0x3fa   :  { %v1137_v0 = vpack.c.bf16 %v2691_v62, %v2689_v57 }
 0x3fb   :  { %2692 = vpow2.f32 %v1131_v46 }
 0x3fc   :  { %2447 = vmatmul.msk.bf16.gmra.mxu0 %vm1086_vm10, %v1137_v0  ;;  %2451 = vmatmul.msk.bf16.gmra.mxu1 %vm1086_vm10, %v1137_v0 }
 0x3fd   :  { %2455 = vmatmul.msk.bf16.gmra.mxu2 %vm1086_vm10, %v1137_v0  ;;  %2467 = vmatmul.msk.bf16.gmra.mxu3 %vm1086_vm10, %v1137_v0 }
 0x3fe   :  { %v1110_v15 = vpop.xlane.xlu1 %1109  ;;  %1542 = vmatpush.bf16.msra.mxu0 %v2633_v54  ;;  %v633_v61 = vpop.permute.xlu2 %632 }
 0x3ff   :  { %v1118_v39 = vsub.f32 %v3440_v58, %v1110_v15  ;;  %v2641_v58 = vld [vmem:[%s4006_s8 + $0x70] sm:$0xff] }
 0x400   :  { %1571 = vmatpush.bf16.msrb.mxu1 %v2641_v58 }
 0x401   :  { %v1133_v1 = vmul.f32 1.442695, %v1118_v39  ;;  %v2693_v43 = vpop.eup %2692  ;;  %v629_v22 = vpop.permute.xlu0 %628 }
 0x402   :  { %1543 = vmatpush.bf16.msra.mxu0 %v2632_v38  ;;  %v641_v41 = vsel %vm56_vm0, %v629_v22, %v3189_v5 }
 0x403   :  { %2694 = vpow2.f32 %v1133_v1  ;;  %v642_v50 = vsel %vm611_vm3, %v641_v41, %v633_v61 }
 0x404   :  { %1572 = vmatpush.bf16.msrb.mxu1 %v2640_v3 }
 0x406   :  { %1544 = vmatpush.bf16.msra.mxu0 %v2631_v7  ;;  %v623_v34 = vpop.permute.xlu2 %622 }
 0x408   :  { %1573 = vmatpush.bf16.msrb.mxu1 %v2639_v11 }
 0x409   :  { %v2695_v19 = vpop.eup %2694  ;;  %v636_v25 = vpop.permute.xlu0 %635 }
 0x40a   :  { %v1138_v47 = vpack.c.bf16 %v2695_v19, %v2693_v43  ;;  %1545 = vmatpush.bf16.msra.mxu0 %v2630_v8  ;;  %v643_v24 = vsel %vm613_vm4, %v642_v50, %v636_v25 }
 0x40b   :  { %v3596_v42 = vrot.slane %v643_v24, 7 }
 0x40c   :  { %2448 = vmatmul.msk.bf16.gmra.mxu0 %vm1086_vm10, %v1138_v47  ;;  %2452 = vmatmul.msk.bf16.gmra.mxu1 %vm1086_vm10, %v1138_v47 }
 0x40d   :  { %2456 = vmatmul.msk.bf16.gmra.mxu2 %vm1086_vm10, %v1138_v47  ;;  %2468 = vmatmul.msk.bf16.gmra.mxu3 %vm1086_vm10, %v1138_v47 }
 0x40e   :  { %1574 = vmatpush.bf16.msrb.mxu1 %v2638_v12  ;;  %1546 = vmatpush.bf16.msra.mxu0 %v2629_v9 }
 0x411   :  { %v626_v40 = vpop.permute.xlu0 %625 }
 0x412   :  { %1575 = vmatpush.bf16.msrb.mxu1 %v2637_v13  ;;  %1547 = vmatpush.bf16.msra.mxu0 %v2628_v21 }
 0x416   :  { %1576 = vmatpush.bf16.msrb.mxu1 %v2636_v4  ;;  %1548 = vmatpush.bf16.msra.mxu0 %v2627_v16  ;;  %v619_v55 = vpop.permute.xlu1 %618 }
 0x417   :  { %v638_v35 = vsel %vm56_vm0, %v619_v55, %v3192_v6 }
 0x418   :  { %v639_v17 = vsel %vm611_vm3, %v638_v35, %v623_v34 }
 0x419   :  { %v3592_v27 = vsel %vm613_vm4, %v639_v17, %v626_v40 }
 0x41a   :  { %1577 = vmatpush.bf16.msrb.mxu1 %v2635_v18  ;;  %v738_v5 = vsel %vm472_vm11, %v3592_v27, %v3596_v42  ;;  %v736_v30 = vsel %vm651_vm5, %v3592_v27, %v3596_v42  ;;  %v741_v39 = vsel %vm475_vm12, %v3592_v27, %v3596_v42  ;;  %v744_v37 = vsel %vm478_vm14, %v3592_v27, %v3596_v42 }
 0x41b   :  { %v747_v41 = vsel %vm481_vm13, %v3592_v27, %v3596_v42  ;;  %vm4019_vm5 = vcmask 1045509  }
 0x41c   :  { %v750_v35 = vsel %vm4019_vm5, %v3592_v27, %v3596_v42 }
 0x41e   :  { %v646_v45 = vpop.permute.xlu1 %645 }
 0x41f   :  { %v3594_v33 = vrot.slane %v646_v45, 6 }
 0x421   :  { %v739_v44 = vsel %vm656_vm7, %v738_v5, %v3594_v33  ;;  %v737_v28 = vsel %vm653_vm6, %v736_v30, %v3594_v33  ;;  %v742_v1 = vsel %vm660_vm8, %v741_v39, %v3594_v33  ;;  %v745_v23 = vsel %vm664_vm9, %v744_v37, %v3594_v33  ;;  %v2645_v30 = vld [vmem:[%s4007_s9] sm:$0xff] }
 0x422   :  { %v740_v59 = vrot.slane %v739_v44, 1  ;;  %v759_v2 = vperm.slane %v737_v28, 0  ;;  %v760_v31 = vperm.slane %v737_v28, 1  ;;  %v761_v0 = vperm.slane %v737_v28, 2  ;;  %v2646_v44 = vld [vmem:[%s4007_s9 + $0x8] sm:$0xff] }
 0x423   :  { %v743_v3 = vrot.slane %v742_v1, 2  ;;  %v746_v43 = vrot.slane %v745_v23, 3  ;;  %vm4020_vm6 = vcmask 1045508   ;;  %vm4021_vm7 = vcmask 1046533   ;;  %1683 = vmatpush.bf16.msra.mxu3 %v2646_v44 }
 0x424   :  { %v762_v14 = vperm.slane %v740_v59, 0  ;;  %v763_v29 = vperm.slane %v740_v59, 1  ;;  %v764_v46 = vperm.slane %v740_v59, 2  ;;  %v748_v17 = vsel %vm4020_vm6, %v747_v41, %v3594_v33 }
 0x425   :  { %v765_v19 = vperm.slane %v743_v3, 0  ;;  %v766_v47 = vperm.slane %v743_v3, 1  ;;  %v768_v11 = vperm.slane %v746_v43, 0  ;;  %v769_v8 = vperm.slane %v746_v43, 1 }
 0x426   :  { %v767_v61 = vperm.slane %v743_v3, 2  ;;  %v770_v55 = vperm.slane %v746_v43, 2  ;;  %v751_v40 = vsel %vm4021_vm7, %v750_v35, %v3594_v33  ;;  %vm4022_vm8 = vcmask 1046529  }
 0x427   :  { %1684 = vmatpush.bf16.msra.mxu3 %v2645_v30 }
 0x459   :  { %v1219_v6 = vpop.f32.mrf.mxu0  ;;  %v1248_v48 = vpop.f32.mrf.mxu1 }
 0x45a   :  { %v1349_v60 = vmul.f32 %v1219_v6, %v759_v2  ;;  %v1350_v53 = vmul.f32 %v1248_v48, %v760_v31  ;;  %v749_v6 = vrot.slane %v748_v17, 4  ;;  %v752_v48 = vrot.slane %v751_v40, 5 }
 0x45c   :  { %v771_v59 = vperm.slane %v749_v6, 0  ;;  %v772_v28 = vperm.slane %v749_v6, 1  ;;  %v774_v31 = vperm.slane %v752_v48, 0 }
 0x460   :  { %v1277_v36 = vpop.f32.mrf.mxu2 }
 0x461   :  { %v1221_v49 = vpop.f32.mrf.mxu0  ;;  %v1250_v51 = vpop.f32.mrf.mxu1  ;;  %v1351_v32 = vmul.f32 %v1277_v36, %v761_v0  ;;  %v775_v36 = vperm.slane %v752_v48, 1 }
 0x462   :  { %v1352_v56 = vmul.f32 %v1221_v49, %v762_v14  ;;  %v1353_v57 = vmul.f32 %v1250_v51, %v763_v29 }
 0x464   :  { %v1373_v62 = vpack.c.bf16 %v1352_v56, %v1349_v60  ;;  %v1374_v26 = vpack.c.bf16 %v1353_v57, %v1350_v53 }
 0x466   :  { %1549 = vmatmul.bf16.vlgmr.msra.gmra.mxu0 %v1373_v62  ;;  %1578 = vmatmul.bf16.vlgmr.msrb.gmra.mxu1 %v1374_v26  ;;  %v773_v62 = vperm.slane %v749_v6, 2  ;;  %v776_v26 = vperm.slane %v752_v48, 2 }
 0x468   :  { %v1279_v15 = vpop.f32.mrf.mxu2 }
 0x469   :  { %v1354_v52 = vmul.f32 %v1279_v15, %v764_v46  ;;  %v1224_v54 = vpop.f32.mrf.mxu0  ;;  %v1253_v58 = vpop.f32.mrf.mxu1  ;;  %v753_v46 = vsel %vm487_vm1, %v3592_v27, %v3596_v42  ;;  %v756_v15 = vsel %vm679_vm15, %v3596_v42, %v3592_v27 }
 0x46a   :  { %v1355_v13 = vmul.f32 %v1224_v54, %v765_v19  ;;  %v1356_v22 = vmul.f32 %v1253_v58, %v766_v47  ;;  %v757_v54 = vsel %vm4022_vm8, %v3594_v33, %v756_v15 }
 0x46b   :  { %v1375_v38 = vpack.c.bf16 %v1354_v52, %v1351_v32  ;;  %v754_v32 = vsel %vm676_vm2, %v3594_v33, %v753_v46 }
 0x46c   :  { %v755_v23 = vrot.slane %v754_v32, 6 }
 0x46d   :  { %2541 = vmatmul.msk.bf16.vlgmr.msrb.gmra.mxu2 %vm56_vm0, %v1375_v38  ;;  %v758_v38 = vrot.slane %v757_v54, 7 }
 0x46e   :  { %v777_v3 = vperm.slane %v755_v23, 0  ;;  %v778_v43 = vperm.slane %v755_v23, 1  ;;  %v779_v33 = vperm.slane %v755_v23, 2 }
 0x46f   :  { %v780_v47 = vperm.slane %v758_v38, 0  ;;  %v781_v27 = vperm.slane %v758_v38, 1 }
 0x470   :  { %v1282_v7 = vpop.f32.mrf.mxu2 }
 0x471   :  { %v1226_v12 = vpop.f32.mrf.mxu0  ;;  %v1255_v9 = vpop.f32.mrf.mxu1  ;;  %v1357_v34 = vmul.f32 %v1282_v7, %v767_v61 }
 0x472   :  { %v1358_v21 = vmul.f32 %v1226_v12, %v768_v11  ;;  %v1359_v4 = vmul.f32 %v1255_v9, %v769_v8 }
 0x474   :  { %v1376_v16 = vpack.c.bf16 %v1358_v21, %v1355_v13  ;;  %v1377_v18 = vpack.c.bf16 %v1359_v4, %v1356_v22  ;;  %v782_v21 = vperm.slane %v758_v38, 2 }
 0x476   :  { %1554 = vmatmul.bf16.gmra.mxu0 %v1376_v16  ;;  %1583 = vmatmul.bf16.gmra.mxu1 %v1377_v18 }
 0x478   :  { %v1284_v25 = vpop.f32.mrf.mxu2 }
 0x479   :  { %v1360_v50 = vmul.f32 %v1284_v25, %v770_v55  ;;  %v1229_v45 = vpop.f32.mrf.mxu0  ;;  %v1258_v24 = vpop.f32.mrf.mxu1 }
 0x47a   :  { %v1361_v49 = vmul.f32 %v1229_v45, %v771_v59  ;;  %v1362_v51 = vmul.f32 %v1258_v24, %v772_v28  ;;  %v1329_v55 = vpop.f32.mrf.mxu3 }
 0x47b   :  { %v1378_v5 = vpack.c.bf16 %v1360_v50, %v1357_v34  ;;  %2696 = vrcp.f32 %v1329_v55 }
 0x47d   :  { %2542 = vmatmul.msk.bf16.gmra.mxu2 %vm56_vm0, %v1378_v5 }
 0x480   :  { %v1287_v2 = vpop.f32.mrf.mxu2 }
 0x481   :  { %v1231_v14 = vpop.f32.mrf.mxu0  ;;  %v1260_v29 = vpop.f32.mrf.mxu1  ;;  %v1363_v39 = vmul.f32 %v1287_v2, %v773_v62 }
 0x482   :  { %v1364_v60 = vmul.f32 %v1231_v14, %v774_v31  ;;  %v1365_v53 = vmul.f32 %v1260_v29, %v775_v36  ;;  %v1331_v35 = vpop.f32.mrf.mxu3  ;;  %v2697_v30 = vpop.eup %2696 }
 0x483   :  { %2698 = vrcp.f32 %v1331_v35 }
 0x484   :  { %v1379_v56 = vpack.c.bf16 %v1364_v60, %v1361_v49  ;;  %v1380_v57 = vpack.c.bf16 %v1365_v53, %v1362_v51 }
 0x486   :  { %1559 = vmatmul.bf16.gmra.mxu0 %v1379_v56  ;;  %1588 = vmatmul.bf16.gmra.mxu1 %v1380_v57 }
 0x488   :  { %v1289_v0 = vpop.f32.mrf.mxu2 }
 0x489   :  { %v1366_v37 = vmul.f32 %v1289_v0, %v776_v26  ;;  %v1234_v52 = vpop.f32.mrf.mxu0  ;;  %v1263_v1 = vpop.f32.mrf.mxu1 }
 0x48a   :  { %v1367_v11 = vmul.f32 %v1234_v52, %v777_v3  ;;  %v1368_v8 = vmul.f32 %v1263_v1, %v778_v43  ;;  %v1334_v17 = vpop.f32.mrf.mxu3  ;;  %v2699_v2 = vpop.eup %2698 }
 0x48b   :  { %v1381_v58 = vpack.c.bf16 %v1366_v37, %v1363_v39  ;;  %2700 = vrcp.f32 %v1334_v17 }
 0x48d   :  { %2543 = vmatmul.msk.bf16.gmra.mxu2 %vm56_vm0, %v1381_v58 }
 0x490   :  { %v1292_v19 = vpop.f32.mrf.mxu2 }
 0x491   :  { %v1236_v42 = vpop.f32.mrf.mxu0  ;;  %v1265_v7 = vpop.f32.mrf.mxu1  ;;  %v1369_v16 = vmul.f32 %v1292_v19, %v779_v33 }
 0x492   :  { %v1370_v12 = vmul.f32 %v1236_v42, %v780_v47  ;;  %v1371_v9 = vmul.f32 %v1265_v7, %v781_v27  ;;  %v1336_v59 = vpop.f32.mrf.mxu3  ;;  %v2701_v46 = vpop.eup %2700 }
 0x493   :  { %2702 = vrcp.f32 %v1336_v59 }
 0x494   :  { %v1382_v13 = vpack.c.bf16 %v1370_v12, %v1367_v11  ;;  %v1383_v22 = vpack.c.bf16 %v1371_v9, %v1368_v8 }
 0x496   :  { %1564 = vmatmul.bf16.gmra.mxu0 %v1382_v13  ;;  %1593 = vmatmul.bf16.gmra.mxu1 %v1383_v22 }
 0x498   :  { %v1294_v4 = vpop.f32.mrf.mxu2 }
 0x499   :  { %v1372_v18 = vmul.f32 %v1294_v4, %v782_v21  ;;  %v2703_v39 = vpop.eup %2702 }
 0x49a   :  { %v1339_v60 = vpop.f32.mrf.mxu3 }
 0x49b   :  { %v1384_v61 = vpack.c.bf16 %v1372_v18, %v1369_v16  ;;  %2704 = vrcp.f32 %v1339_v60  ;;  %v2731_v60 = vld [vmem:[%s3998_s0 + $0x10] sm:$0xff] }
 0x49d   :  { %2544 = vmatmul.msk.bf16.gmra.mxu2 %vm56_vm0, %v1384_v61 }
 0x4a1   :  { %v2705_v27 = vpop.eup %2704 }
 0x4a2   :  { %v1341_v52 = vpop.f32.mrf.mxu3 }
 0x4a3   :  { %2706 = vrcp.f32 %v1341_v52  ;;  %v2733_v52 = vld [vmem:[%s3998_s0 + $0x20] sm:$0xff] }
 0x4a9   :  { %v2707_v7 = vpop.eup %2706 }
 0x4aa   :  { %v1344_v3 = vpop.f32.mrf.mxu3 }
 0x4ab   :  { %2708 = vrcp.f32 %v1344_v3  ;;  %v2734_v3 = vld [vmem:[%s3998_s0 + $0x28] sm:$0xff] }
 0x4b2   :  { %v1346_v33 = vpop.f32.mrf.mxu3 }
 0x4b3   :  { %2710 = vrcp.f32 %v1346_v33 }
 0x4e3   :  { %v1550_v25 = vpop.f32.mrf.mxu0  ;;  %v1579_v41 = vpop.f32.mrf.mxu1 }
 0x4e4   :  { %v1580_v5 = vadd.f32 %v1579_v41, %v1550_v25  ;;  %v2709_v25 = vpop.eup %2708 }
 0x4e5   :  { %v2711_v35 = vpop.eup %2710 }
 0x4eb   :  { %v1552_v34 = vpop.f32.mrf.mxu0  ;;  %v1581_v50 = vpop.f32.mrf.mxu1 }
 0x4ec   :  { %v1582_v6 = vadd.f32 %v1581_v50, %v1552_v34 }
 0x4f0   :  { %v1608_v45 = vpop.f32.mrf.mxu2 }
 0x4f1   :  { %v1609_v48 = vadd.f32 %v1608_v45, %v1580_v5  ;;  %v3655_v45 = vld [vmem:[%s4000_s2] sm:$0xff] }
 0x4f3   :  { %v1555_v24 = vpop.f32.mrf.mxu0  ;;  %v1584_v40 = vpop.f32.mrf.mxu1  ;;  %v1636_v31 = vmul.f32 %v2697_v30, %v1609_v48  ;;  %v2729_v48 = vld [vmem:[%s3998_s0] sm:$0xff] }
 0x4f4   :  { %v1585_v53 = vadd.f32 %v1584_v40, %v1555_v24  ;;  %v1652_v24 = vperm.slane %v3655_v45, 2 }
 0x4f8   :  { %v1610_v44 = vpop.f32.mrf.mxu2 }
 0x4f9   :  { %v1611_v28 = vadd.f32 %v1610_v44, %v1582_v6 }
 0x4fb   :  { %v1637_v36 = vmul.f32 %v2699_v2, %v1611_v28  ;;  %v1557_v14 = vpop.f32.mrf.mxu0  ;;  %v1586_v29 = vpop.f32.mrf.mxu1 }
 0x4fc   :  { %v1587_v62 = vadd.f32 %v1586_v29, %v1557_v14 }
 0x4fd   :  { %v1644_v49 = vpack.c.bf16 %v1637_v36, %v1636_v31  ;;  %v2730_v31 = vld [vmem:[%s3998_s0 + $0x8] sm:$0xff] }
 0x4ff   :  { %2553 = vmatmul.msk.bf16.vlgmr.msra.gmra.mxu3 %vm56_vm0, %v1644_v49 }
 0x500   :  { %v1613_v51 = vpop.f32.mrf.mxu2 }
 0x501   :  { %v1614_v26 = vadd.f32 %v1613_v51, %v1585_v53 }
 0x503   :  { %v1560_v56 = vpop.f32.mrf.mxu0  ;;  %v1589_v57 = vpop.f32.mrf.mxu1  ;;  %v1638_v37 = vmul.f32 %v2701_v46, %v1614_v26 }
 0x504   :  { %v1590_v38 = vadd.f32 %v1589_v57, %v1560_v56 }
 0x508   :  { %v1615_v0 = vpop.f32.mrf.mxu2 }
 0x509   :  { %v1616_v15 = vadd.f32 %v1615_v0, %v1587_v62  ;;  %v2732_v0 = vld [vmem:[%s3998_s0 + $0x18] sm:$0xff] }
 0x50b   :  { %v1639_v32 = vmul.f32 %v2703_v39, %v1616_v15  ;;  %v1562_v54 = vpop.f32.mrf.mxu0  ;;  %v1591_v58 = vpop.f32.mrf.mxu1 }
 0x50c   :  { %v1592_v43 = vadd.f32 %v1591_v58, %v1562_v54 }
 0x50d   :  { %v1645_v1 = vpack.c.bf16 %v1639_v32, %v1638_v37 }
 0x50f   :  { %2554 = vmatmul.msk.bf16.gmra.mxu3 %vm56_vm0, %v1645_v1 }
 0x510   :  { %v1618_v23 = vpop.f32.mrf.mxu2 }
 0x511   :  { %v1619_v19 = vadd.f32 %v1618_v23, %v1590_v38 }
 0x513   :  { %v1565_v11 = vpop.f32.mrf.mxu0  ;;  %v1594_v8 = vpop.f32.mrf.mxu1  ;;  %v1640_v12 = vmul.f32 %v2705_v27, %v1619_v19 }
 0x514   :  { %v1595_v16 = vadd.f32 %v1594_v8, %v1565_v11 }
 0x518   :  { %v1620_v47 = vpop.f32.mrf.mxu2 }
 0x519   :  { %v1621_v42 = vadd.f32 %v1620_v47, %v1592_v43 }
 0x51b   :  { %v1641_v9 = vmul.f32 %v2707_v7, %v1621_v42  ;;  %v1567_v21 = vpop.f32.mrf.mxu0  ;;  %v1596_v4 = vpop.f32.mrf.mxu1  ;;  %v2735_v7 = vld [vmem:[%s3998_s0 + $0x30] sm:$0xff] }
 0x51c   :  { %v1597_v18 = vadd.f32 %v1596_v4, %v1567_v21 }
 0x51d   :  { %v1646_v13 = vpack.c.bf16 %v1641_v9, %v1640_v12 }
 0x51f   :  { %2555 = vmatmul.msk.bf16.gmra.mxu3 %vm56_vm0, %v1646_v13 }
 0x520   :  { %v1623_v22 = vpop.f32.mrf.mxu2 }
 0x521   :  { %v1624_v61 = vadd.f32 %v1623_v22, %v1595_v16 }
 0x523   :  { %v1642_v34 = vmul.f32 %v2709_v25, %v1624_v61  ;;  %v2736_v25 = vld [vmem:[%s3998_s0 + $0x38] sm:$0xff] }
 0x528   :  { %v1625_v55 = vpop.f32.mrf.mxu2 }
 0x529   :  { %v1626_v41 = vadd.f32 %v1625_v55, %v1597_v18 }
 0x52b   :  { %v1643_v50 = vmul.f32 %v2711_v35, %v1626_v41 }
 0x52d   :  { %v1647_v17 = vpack.c.bf16 %v1643_v50, %v1642_v34 }
 0x52f   :  { %2556 = vmatmul.msk.bf16.gmra.mxu3 %vm56_vm0, %v1647_v17 }
 0x582   :  { %v1686_v40 = vpop.f32.mrf.mxu3 }
 0x583   :  { %v1687_v5 = vadd.f32 %v1686_v40, %v1652_v24 }
 0x585   :  { %v1706_v6 = vmax.f32 %v1687_v5, 0.0 }
 0x587   :  { %v1714_v44 = vadd.f32 %v2729_v48, %v1706_v6 }
 0x589   :  { %v1722_v30 = vsel %vm56_vm0, %v1714_v44, 0.0 }
 0x58a   :  { %v1688_v59 = vpop.f32.mrf.mxu3  ;;  %1723 = vadd.xlane.f32.xlu2 %v1722_v30 }
 0x58b   :  { %v1689_v28 = vadd.f32 %v1688_v59, %v1652_v24 }
 0x58d   :  { %v1707_v2 = vmax.f32 %v1689_v28, 0.0 }
 0x58f   :  { %v1715_v36 = vadd.f32 %v2730_v31, %v1707_v2 }
 0x591   :  { %v1725_v14 = vsel %vm56_vm0, %v1715_v36, 0.0 }
 0x592   :  { %1726 = vadd.xlane.f32.xlu0 %v1725_v14  ;;  %v1691_v29 = vpop.f32.mrf.mxu3 }
 0x593   :  { %v1692_v49 = vadd.f32 %v1691_v29, %v1652_v24 }
 0x595   :  { %v1708_v51 = vmax.f32 %v1692_v49, 0.0 }
 0x597   :  { %v1716_v53 = vadd.f32 %v2731_v60, %v1708_v51 }
 0x599   :  { %v1728_v56 = vsel %vm56_vm0, %v1716_v53, 0.0 }
 0x59a   :  { %v1693_v57 = vpop.f32.mrf.mxu3  ;;  %1729 = vadd.xlane.f32.xlu1 %v1728_v56 }
 0x59b   :  { %v1694_v62 = vadd.f32 %v1693_v57, %v1652_v24 }
 0x59d   :  { %v1709_v26 = vmax.f32 %v1694_v62, 0.0 }
 0x59f   :  { %v1717_v46 = vadd.f32 %v2732_v0, %v1709_v26 }
 0x5a1   :  { %v1731_v15 = vsel %vm56_vm0, %v1717_v46, 0.0 }
 0x5a2   :  { %1732 = vadd.xlane.f32.xlu2 %v1731_v15  ;;  %v1696_v39 = vpop.f32.mrf.mxu3 }
 0x5a3   :  { %v1697_v37 = vadd.f32 %v1696_v39, %v1652_v24 }
 0x5a5   :  { %v1710_v32 = vmax.f32 %v1697_v37, 0.0 }
 0x5a7   :  { %v1718_v1 = vadd.f32 %v2733_v52, %v1710_v32 }
 0x5a9   :  { %v1734_v54 = vsel %vm56_vm0, %v1718_v1, 0.0 }
 0x5aa   :  { %v1698_v58 = vpop.f32.mrf.mxu3  ;;  %1735 = vadd.xlane.f32.xlu0 %v1734_v54 }
 0x5ab   :  { %v1699_v23 = vadd.f32 %v1698_v58, %v1652_v24 }
 0x5ad   :  { %v1711_v38 = vmax.f32 %v1699_v23, 0.0 }
 0x5af   :  { %v1719_v43 = vadd.f32 %v2734_v3, %v1711_v38 }
 0x5b1   :  { %v1737_v19 = vsel %vm56_vm0, %v1719_v43, 0.0 }
 0x5b2   :  { %1738 = vadd.xlane.f32.xlu1 %v1737_v19  ;;  %v1701_v47 = vpop.f32.mrf.mxu3 }
 0x5b3   :  { %v1702_v27 = vadd.f32 %v1701_v47, %v1652_v24 }
 0x5b5   :  { %v1712_v42 = vmax.f32 %v1702_v27, 0.0 }
 0x5b7   :  { %v1720_v11 = vadd.f32 %v2735_v7, %v1712_v42 }
 0x5b9   :  { %v1740_v8 = vsel %vm56_vm0, %v1720_v11, 0.0 }
 0x5ba   :  { %1741 = vadd.xlane.f32.xlu1 %v1740_v8  ;;  %v1703_v12 = vpop.f32.mrf.mxu3 }
 0x5bb   :  { %v1704_v22 = vadd.f32 %v1703_v12, %v1652_v24 }
 0x5bd   :  { %v1713_v4 = vmax.f32 %v1704_v22, 0.0 }
 0x5bf   :  { %v1721_v41 = vadd.f32 %v2736_v25, %v1713_v4 }
 0x5c1   :  { %v1743_v50 = vsel %vm56_vm0, %v1721_v41, 0.0 }
 0x5fd   :  { %v1724_v9 = vpop.xlane.xlu2 %1723 }
 0x5fe   :  { %v1746_v13 = vmul.f32 %v1724_v9, %v2866_v20 }
 0x600   :  { %v3687_v33 = vsub.f32 %v1714_v44, %v1746_v13 }
 0x602   :  { %v1762_v21 = vmul.f32 %v3687_v33, %v3687_v33 }
 0x604   :  { %v1770_v16 = vsel %vm56_vm0, %v1762_v21, 0.0 }
 0x605   :  { %v1727_v18 = vpop.xlane.xlu0 %1726  ;;  %1771 = vadd.xlane.f32.xlu2 %v1770_v16 }
 0x606   :  { %v1747_v61 = vmul.f32 %v1727_v18, %v2866_v20 }
 0x608   :  { %v3693_v55 = vsub.f32 %v1715_v36, %v1747_v61 }
 0x60a   :  { %v1763_v35 = vmul.f32 %v3693_v55, %v3693_v55 }
 0x60c   :  { %v1773_v34 = vsel %vm56_vm0, %v1763_v35, 0.0 }
 0x60d   :  { %v1730_v17 = vpop.xlane.xlu1 %1729  ;;  %1774 = vadd.xlane.f32.xlu0 %v1773_v34  ;;  %1744 = vadd.xlane.f32.xlu2 %v1743_v50 }
 0x60e   :  { %v1748_v24 = vmul.f32 %v1730_v17, %v2866_v20 }
 0x610   :  { %v3703_v40 = vsub.f32 %v1716_v53, %v1748_v24 }
 0x612   :  { %v1764_v5 = vmul.f32 %v3703_v40, %v3703_v40 }
 0x614   :  { %v1776_v6 = vsel %vm56_vm0, %v1764_v5, 0.0 }
 0x615   :  { %v1733_v48 = vpop.xlane.xlu2 %1732  ;;  %1777 = vadd.xlane.f32.xlu0 %v1776_v6 }
 0x616   :  { %v1749_v44 = vmul.f32 %v1733_v48, %v2866_v20 }
 0x618   :  { %v3709_v30 = vsub.f32 %v1717_v46, %v1749_v44 }
 0x61a   :  { %v1765_v59 = vmul.f32 %v3709_v30, %v3709_v30 }
 0x61c   :  { %v1779_v28 = vsel %vm56_vm0, %v1765_v59, 0.0 }
 0x61d   :  { %v1736_v2 = vpop.xlane.xlu0 %1735  ;;  %1780 = vadd.xlane.f32.xlu1 %v1779_v28 }
 0x61e   :  { %v1750_v31 = vmul.f32 %v1736_v2, %v2866_v20 }
 0x620   :  { %v3715_v36 = vsub.f32 %v1718_v1, %v1750_v31 }
 0x622   :  { %v1766_v14 = vmul.f32 %v3715_v36, %v3715_v36 }
 0x624   :  { %v1782_v29 = vsel %vm56_vm0, %v1766_v14, 0.0 }
 0x625   :  { %v1739_v49 = vpop.xlane.xlu1 %1738  ;;  %1783 = vadd.xlane.f32.xlu2 %v1782_v29 }
 0x626   :  { %v1751_v51 = vmul.f32 %v1739_v49, %v2866_v20 }
 0x628   :  { %v3721_v60 = vsub.f32 %v1719_v43, %v1751_v51  ;;  %v2648_v43 = vld [vmem:[%s4008_s10 + $0x8] sm:$0xff] }
 0x629   :  { %1953 = vmatpush.bf16.msrb.mxu0 %v2648_v43 }
 0x62a   :  { %v1767_v53 = vmul.f32 %v3721_v60, %v3721_v60 }
 0x62c   :  { %v1785_v56 = vsel %vm56_vm0, %v1767_v53, 0.0 }
 0x62d   :  { %1786 = vadd.xlane.f32.xlu0 %v1785_v56  ;;  %v1742_v57 = vpop.xlane.xlu1 %1741 }
 0x62e   :  { %v1752_v62 = vmul.f32 %v1742_v57, %v2866_v20 }
 0x630   :  { %v3727_v26 = vsub.f32 %v1720_v11, %v1752_v62  ;;  %v2647_v11 = vld [vmem:[%s4008_s10] sm:$0xff] }
 0x631   :  { %1954 = vmatpush.bf16.msrb.mxu0 %v2647_v11 }
 0x632   :  { %v1768_v0 = vmul.f32 %v3727_v26, %v3727_v26 }
 0x634   :  { %v1788_v46 = vsel %vm56_vm0, %v1768_v0, 0.0 }
 0x635   :  { %1789 = vadd.xlane.f32.xlu1 %v1788_v46 }
 0x678   :  { %v1772_v15 = vpop.xlane.xlu2 %1771 }
 0x679   :  { %v1794_v39 = vmul.f32 %v1772_v15, %v2866_v20 }
 0x67b   :  { %v1802_v37 = vadd.f32 1e-05, %v1794_v39 }
 0x67d   :  { %2712 = vrsqrt.f32 %v1802_v37  ;;  %vm1816_vm2 = vweird.f32 %v1802_v37 }
 0x680   :  { %v1775_v32 = vpop.xlane.xlu0 %1774  ;;  %v1745_v52 = vpop.xlane.xlu2 %1744 }
 0x681   :  { %v1795_v1 = vmul.f32 %v1775_v32, %v2866_v20  ;;  %v1753_v54 = vmul.f32 %v1745_v52, %v2866_v20 }
 0x683   :  { %v2713_v58 = vpop.eup %2712  ;;  %v1803_v23 = vadd.f32 1e-05, %v1795_v1  ;;  %v3735_v38 = vsub.f32 %v1721_v41, %v1753_v54 }
 0x684   :  { %v1811_v3 = vmul.f32 %v2713_v58, %v1802_v37  ;;  %vm1817_vm15 = vweird.f32 %v2713_v58 }
 0x685   :  { %2714 = vrsqrt.f32 %v1803_v23  ;;  %v1769_v19 = vmul.f32 %v3735_v38, %v3735_v38  ;;  %vm1818_vm9 = vmor %vm1816_vm2, %vm1817_vm15  ;;  %vm1826_vm5 = vweird.f32 %v1803_v23 }
 0x686   :  { %v1812_v47 = vmul.f32 %v2713_v58, %v1811_v3 }
 0x687   :  { %v1791_v27 = vsel %vm56_vm0, %v1769_v19, 0.0 }
 0x688   :  { %v1813_v42 = vmul.f32 0.5, %v1812_v47  ;;  %v1778_v7 = vpop.xlane.xlu0 %1777  ;;  %1792 = vadd.xlane.f32.xlu2 %v1791_v27 }
 0x689   :  { %v1796_v8 = vmul.f32 %v1778_v7, %v2866_v20 }
 0x68a   :  { %v1814_v12 = vsub.f32 1.5, %v1813_v42 }
 0x68b   :  { %v2715_v9 = vpop.eup %2714  ;;  %v1804_v13 = vadd.f32 1e-05, %v1796_v8 }
 0x68c   :  { %v1815_v22 = vmul.f32 %v2713_v58, %v1814_v12  ;;  %v1821_v21 = vmul.f32 %v2715_v9, %v1803_v23  ;;  %vm1827_vm10 = vweird.f32 %v2715_v9 }
 0x68d   :  { %2716 = vrsqrt.f32 %v1804_v13  ;;  %vm1828_vm6 = vmor %vm1826_vm5, %vm1827_vm10  ;;  %vm1836_vm8 = vweird.f32 %v1804_v13 }
 0x68e   :  { %v1822_v4 = vmul.f32 %v2715_v9, %v1821_v21  ;;  %v1819_v16 = vsel %vm1818_vm9, %v2713_v58, %v1815_v22 }
 0x68f   :  { %v1890_v34 = vmul.f32 %v1819_v16, %v3687_v33 }
 0x690   :  { %v1823_v18 = vmul.f32 0.5, %v1822_v4  ;;  %v1781_v61 = vpop.xlane.xlu1 %1780 }
 0x691   :  { %v1797_v25 = vmul.f32 %v1781_v61, %v2866_v20  ;;  %v1898_v48 = vmul.f32 %v1890_v34, %v2991_v63 }
 0x692   :  { %v1824_v41 = vsub.f32 1.5, %v1823_v18 }
 0x693   :  { %v2717_v35 = vpop.eup %2716  ;;  %v1805_v50 = vadd.f32 1e-05, %v1797_v25  ;;  %v3754_v29 = vadd.f32 %v1898_v48, %v2998_v10 }
 0x694   :  { %v1825_v17 = vmul.f32 %v2715_v9, %v1824_v41  ;;  %v1831_v24 = vmul.f32 %v2717_v35, %v1804_v13  ;;  %vm1837_vm7 = vweird.f32 %v2717_v35 }
 0x695   :  { %2718 = vrsqrt.f32 %v1805_v50  ;;  %vm1838_vm15 = vmor %vm1836_vm8, %vm1837_vm7  ;;  %vm1846_vm9 = vweird.f32 %v1805_v50 }
 0x696   :  { %v1829_v5 = vsel %vm1828_vm6, %v2715_v9, %v1825_v17  ;;  %v1832_v6 = vmul.f32 %v2717_v35, %v1831_v24 }
 0x697   :  { %v1891_v44 = vmul.f32 %v1829_v5, %v3693_v55 }
 0x698   :  { %v1833_v59 = vmul.f32 0.5, %v1832_v6  ;;  %v1784_v28 = vpop.xlane.xlu2 %1783 }
 0x699   :  { %v1899_v2 = vmul.f32 %v1891_v44, %v2991_v63  ;;  %v1798_v31 = vmul.f32 %v1784_v28, %v2866_v20 }
 0x69a   :  { %v1834_v14 = vsub.f32 1.5, %v1833_v59 }
 0x69b   :  { %v2719_v33 = vpop.eup %2718  ;;  %v3757_v49 = vadd.f32 %v1899_v2, %v2998_v10  ;;  %v1806_v51 = vadd.f32 1e-05, %v1798_v31 }
 0x69c   :  { %v1835_v53 = vmul.f32 %v2717_v35, %v1834_v14  ;;  %v1841_v56 = vmul.f32 %v2719_v33, %v1805_v50  ;;  %vm1847_vm2 = vweird.f32 %v2719_v33 }
 0x69d   :  { %v1914_v55 = vpack.c.bf16 %v3757_v49, %v3754_v29  ;;  %2720 = vrsqrt.f32 %v1806_v51  ;;  %vm1848_vm10 = vmor %vm1846_vm9, %vm1847_vm2  ;;  %vm1856_vm6 = vweird.f32 %v1806_v51 }
 0x69e   :  { %v1842_v57 = vmul.f32 %v2719_v33, %v1841_v56  ;;  %v1839_v62 = vsel %vm1838_vm15, %v2717_v35, %v1835_v53 }
 0x69f   :  { %2565 = vmatmul.msk.bf16.vlgmr.msrb.gmra.mxu0 %vm56_vm0, %v1914_v55  ;;  %v1892_v32 = vmul.f32 %v1839_v62, %v3703_v40 }
 0x6a0   :  { %v1843_v0 = vmul.f32 0.5, %v1842_v57  ;;  %v1787_v46 = vpop.xlane.xlu0 %1786 }
 0x6a1   :  { %v1799_v15 = vmul.f32 %v1787_v46, %v2866_v20  ;;  %v1900_v43 = vmul.f32 %v1892_v32, %v2991_v63 }
 0x6a2   :  { %v1844_v39 = vsub.f32 1.5, %v1843_v0 }
 0x6a3   :  { %v2721_v37 = vpop.eup %2720  ;;  %v1807_v52 = vadd.f32 1e-05, %v1799_v15  ;;  %v3768_v7 = vadd.f32 %v1900_v43, %v2998_v10 }
 0x6a4   :  { %v1845_v1 = vmul.f32 %v2719_v33, %v1844_v39  ;;  %v1851_v54 = vmul.f32 %v2721_v37, %v1806_v51  ;;  %vm1857_vm5 = vweird.f32 %v2721_v37  ;;  %v2650_v51 = vld [vmem:[%s4009_s11 + $0x8] sm:$0xff] }
 0x6a5   :  { %2722 = vrsqrt.f32 %v1807_v52  ;;  %vm1858_vm7 = vmor %vm1856_vm6, %vm1857_vm5  ;;  %vm1866_vm15 = vweird.f32 %v1807_v52  ;;  %2023 = vmatpush.bf16.msra.mxu1 %v2650_v51 }
 0x6a6   :  { %v1849_v58 = vsel %vm1848_vm10, %v2719_v33, %v1845_v1  ;;  %v1852_v23 = vmul.f32 %v2721_v37, %v1851_v54  ;;  %v1922_v1 = vperm.slane %v3655_v45, 3 }
 0x6a7   :  { %v1893_v3 = vmul.f32 %v1849_v58, %v3709_v30 }
 0x6a8   :  { %v1853_v19 = vmul.f32 0.5, %v1852_v23 }
 0x6a9   :  { %v1901_v47 = vmul.f32 %v1893_v3, %v2991_v63 }
 0x6aa   :  { %v1854_v27 = vsub.f32 1.5, %v1853_v19 }
 0x6ab   :  { %v2723_v42 = vpop.eup %2722  ;;  %v3771_v40 = vadd.f32 %v1901_v47, %v2998_v10 }
 0x6ac   :  { %v1855_v11 = vmul.f32 %v2721_v37, %v1854_v27  ;;  %v1861_v8 = vmul.f32 %v2723_v42, %v1807_v52  ;;  %vm1867_vm8 = vweird.f32 %v2723_v42 }
 0x6ad   :  { %v1915_v12 = vpack.c.bf16 %v3771_v40, %v3768_v7  ;;  %vm1868_vm2 = vmor %vm1866_vm15, %vm1867_vm8  ;;  %vm4023_vm15 = vcmask 1045509  }
 0x6ae   :  { %v1862_v30 = vmul.f32 %v2723_v42, %v1861_v8  ;;  %v1859_v9 = vsel %vm1858_vm7, %v2721_v37, %v1855_v11 }
 0x6af   :  { %2566 = vmatmul.msk.bf16.gmra.mxu0 %vm56_vm0, %v1915_v12  ;;  %v1894_v21 = vmul.f32 %v1859_v9, %v3715_v36  ;;  %v1790_v36 = vpop.xlane.xlu1 %1789 }
 0x6b0   :  { %v1863_v13 = vmul.f32 0.5, %v1862_v30  ;;  %v1800_v50 = vmul.f32 %v1790_v36, %v2866_v20 }
 0x6b1   :  { %v1902_v61 = vmul.f32 %v1894_v21, %v2991_v63 }
 0x6b2   :  { %v1864_v22 = vsub.f32 1.5, %v1863_v13  ;;  %v1808_v17 = vadd.f32 1e-05, %v1800_v50 }
 0x6b3   :  { %v3781_v41 = vadd.f32 %v1902_v61, %v2998_v10 }
 0x6b4   :  { %v1865_v4 = vmul.f32 %v2723_v42, %v1864_v22  ;;  %2724 = vrsqrt.f32 %v1808_v17  ;;  %vm1876_vm10 = vweird.f32 %v1808_v17 }
 0x6b6   :  { %v1869_v16 = vsel %vm1868_vm2, %v2723_v42, %v1865_v4  ;;  %v2652_v4 = vld [vmem:[%s4010_s12 + $0x8] sm:$0xff]  ;;  %vm4024_vm2 = vmmov %vm4023_vm15 }
 0x6b7   :  { %v1895_v18 = vmul.f32 %v1869_v16, %v3721_v60  ;;  %2093 = vmatpush.bf16.msra.mxu2 %v2652_v4 }
 0x6b9   :  { %v1903_v25 = vmul.f32 %v1895_v18, %v2991_v63  ;;  %v2651_v18 = vld [vmem:[%s4010_s12] sm:$0xff]  ;;  %s2767_s12 = smov [#allocation2]  }
 0x6ba   :  { %v2725_v60 = vpop.eup %2724 }
 0x6bb   :  { %v3784_v35 = vadd.f32 %v1903_v25, %v2998_v10  ;;  %v1871_v24 = vmul.f32 %v2725_v60, %v1808_v17  ;;  %vm1877_vm9 = vweird.f32 %v2725_v60  ;;  %2094 = vmatpush.bf16.msra.mxu2 %v2651_v18 }
 0x6bc   :  { %vm1878_vm5 = vmor %vm1876_vm10, %vm1877_vm9 }
 0x6bd   :  { %v1916_v34 = vpack.c.bf16 %v3784_v35, %v3781_v41  ;;  %v1872_v5 = vmul.f32 %v2725_v60, %v1871_v24  ;;  %v1992_v24 = vperm.slane %v3655_v45, 4  ;;  %vm4025_vm9 = vmmov %vm4024_vm2 }
 0x6be   :  { %vm4026_vm10 = vmmov %vm4024_vm2 }
 0x6bf   :  { %2567 = vmatmul.msk.bf16.gmra.mxu0 %vm56_vm0, %v1916_v34  ;;  %v1873_v59 = vmul.f32 0.5, %v1872_v5 }
 0x6c1   :  { %v1874_v28 = vsub.f32 1.5, %v1873_v59 }
 0x6c3   :  { %v1875_v31 = vmul.f32 %v2725_v60, %v1874_v28 }
 0x6c5   :  { %v1879_v53 = vsel %vm1878_vm5, %v2725_v60, %v1875_v31  ;;  %vm4027_vm5 = vmmov %vm4024_vm2 }
 0x6c6   :  { %v1896_v57 = vmul.f32 %v1879_v53, %v3727_v26 }
 0x6c8   :  { %v1904_v15 = vmul.f32 %v1896_v57, %v2991_v63 }
 0x6ca   :  { %v3802_v37 = vadd.f32 %v1904_v15, %v2998_v10 }
 0x6fb   :  { %v1793_v6 = vpop.xlane.xlu2 %1792 }
 0x6fc   :  { %v1801_v48 = vmul.f32 %v1793_v6, %v2866_v20  ;;  %v2649_v20 = vld [vmem:[%s4009_s11] sm:$0xff] }
 0x6fd   :  { %2024 = vmatpush.bf16.msra.mxu1 %v2649_v20 }
 0x6fe   :  { %v1809_v44 = vadd.f32 1e-05, %v1801_v48 }
 0x700   :  { %2726 = vrsqrt.f32 %v1809_v44  ;;  %vm1886_vm7 = vweird.f32 %v1809_v44 }
 0x706   :  { %v2727_v2 = vpop.eup %2726 }
 0x707   :  { %v1881_v14 = vmul.f32 %v2727_v2, %v1809_v44  ;;  %vm1887_vm6 = vweird.f32 %v2727_v2 }
 0x708   :  { %vm1888_vm8 = vmor %vm1886_vm7, %vm1887_vm6  ;;  %vm4028_vm6 = vcmask 1047559  }
 0x709   :  { %v1882_v33 = vmul.f32 %v2727_v2, %v1881_v14  ;;  %vm4029_vm7 = vmmov %vm4028_vm6 }
 0x70b   :  { %v1883_v56 = vmul.f32 0.5, %v1882_v33 }
 0x70d   :  { %v1884_v55 = vsub.f32 1.5, %v1883_v56 }
 0x70f   :  { %v1885_v62 = vmul.f32 %v2727_v2, %v1884_v55 }
 0x711   :  { %v1889_v0 = vsel %vm1888_vm8, %v2727_v2, %v1885_v62  ;;  %vm4030_vm8 = vmmov %vm4028_vm6 }
 0x712   :  { %v1897_v46 = vmul.f32 %v1889_v0, %v3735_v38 }
 0x714   :  { %v1905_v39 = vmul.f32 %v1897_v46, %v2991_v63 }
 0x716   :  { %v3805_v32 = vadd.f32 %v1905_v39, %v2998_v10 }
 0x718   :  { %v1917_v26 = vpack.c.bf16 %v3805_v32, %v3802_v37 }
 0x71a   :  { %2568 = vmatmul.msk.bf16.gmra.mxu0 %vm56_vm0, %v1917_v26 }
 0x71c   :  { %v1956_v52 = vpop.f32.mrf.mxu0 }
 0x71d   :  { %v1957_v54 = vadd.f32 %v1956_v52, %v1922_v1 }
 0x71f   :  { %v1976_v23 = vmax.f32 %v1957_v54, 0.0 }
 0x724   :  { %v1958_v38 = vpop.f32.mrf.mxu0 }
 0x725   :  { %v1959_v58 = vadd.f32 %v1958_v38, %v1922_v1 }
 0x727   :  { %v1977_v3 = vmax.f32 %v1959_v58, 0.0 }
 0x729   :  { %v1984_v63 = vpack.c.bf16 %v1977_v3, %v1976_v23  ;;  %v3827_v23 = vperm.slane %v3655_v45, 5 }
 0x72b   :  { %2577 = vmatmul.msk.bf16.vlgmr.msra.gmra.mxu1 %vm56_vm0, %v1984_v63 }
 0x72c   :  { %v1961_v43 = vpop.f32.mrf.mxu0 }
 0x72d   :  { %v1962_v19 = vadd.f32 %v1961_v43, %v1922_v1 }
 0x72f   :  { %v1978_v27 = vmax.f32 %v1962_v19, 0.0 }
 0x734   :  { %v1963_v10 = vpop.f32.mrf.mxu0 }
 0x735   :  { %v1964_v47 = vadd.f32 %v1963_v10, %v1922_v1 }
 0x737   :  { %v1979_v42 = vmax.f32 %v1964_v47, 0.0 }
 0x739   :  { %v1985_v11 = vpack.c.bf16 %v1979_v42, %v1978_v27 }
 0x73b   :  { %2578 = vmatmul.msk.bf16.gmra.mxu1 %vm56_vm0, %v1985_v11 }
 0x73c   :  { %v1966_v8 = vpop.f32.mrf.mxu0 }
 0x73d   :  { %v1967_v12 = vadd.f32 %v1966_v8, %v1922_v1 }
 0x73f   :  { %v1980_v13 = vmax.f32 %v1967_v12, 0.0 }
 0x744   :  { %v1968_v30 = vpop.f32.mrf.mxu0 }
 0x745   :  { %v1969_v9 = vadd.f32 %v1968_v30, %v1922_v1 }
 0x747   :  { %v1981_v22 = vmax.f32 %v1969_v9, 0.0 }
 0x749   :  { %v1986_v21 = vpack.c.bf16 %v1981_v22, %v1980_v13 }
 0x74b   :  { %2579 = vmatmul.msk.bf16.gmra.mxu1 %vm56_vm0, %v1986_v21 }
 0x797   :  { %v1971_v16 = vpop.f32.mrf.mxu0 }
 0x798   :  { %v1972_v61 = vadd.f32 %v1971_v16, %v1922_v1 }
 0x79a   :  { %v1982_v36 = vmax.f32 %v1972_v61, 0.0 }
 0x79f   :  { %v1973_v25 = vpop.f32.mrf.mxu0 }
 0x7a0   :  { %v1974_v34 = vadd.f32 %v1973_v25, %v1922_v1 }
 0x7a2   :  { %v1983_v50 = vmax.f32 %v1974_v34, 0.0 }
 0x7a4   :  { %v1987_v17 = vpack.c.bf16 %v1983_v50, %v1982_v36 }
 0x7a6   :  { %2580 = vmatmul.msk.bf16.gmra.mxu1 %vm56_vm0, %v1987_v17 }
 0x7a8   :  { %v2026_v60 = vpop.f32.mrf.mxu1 }
 0x7a9   :  { %v2027_v5 = vadd.f32 %v2026_v60, %v1992_v24 }
 0x7ab   :  { %v2046_v44 = vmax.f32 %v2027_v5, 0.0 }
 0x7b0   :  { %v2028_v6 = vpop.f32.mrf.mxu1 }
 0x7b1   :  { %v2029_v48 = vadd.f32 %v2028_v6, %v1992_v24 }
 0x7b3   :  { %v2047_v59 = vmax.f32 %v2029_v48, 0.0 }
 0x7b5   :  { %v2054_v28 = vpack.c.bf16 %v2047_v59, %v2046_v44 }
 0x7b7   :  { %2589 = vmatmul.msk.bf16.vlgmr.msra.gmra.mxu2 %vm56_vm0, %v2054_v28 }
 0x7b8   :  { %v2031_v2 = vpop.f32.mrf.mxu1 }
 0x7b9   :  { %v2032_v31 = vadd.f32 %v2031_v2, %v1992_v24 }
 0x7bb   :  { %v2048_v51 = vmax.f32 %v2032_v31, 0.0 }
 0x7c0   :  { %v2033_v14 = vpop.f32.mrf.mxu1 }
 0x7c1   :  { %v2034_v33 = vadd.f32 %v2033_v14, %v1992_v24 }
 0x7c3   :  { %v2049_v53 = vmax.f32 %v2034_v33, 0.0 }
 0x7c5   :  { %v2055_v56 = vpack.c.bf16 %v2049_v53, %v2048_v51 }
 0x7c7   :  { %2590 = vmatmul.msk.bf16.gmra.mxu2 %vm56_vm0, %v2055_v56 }
 0x7c8   :  { %v2036_v20 = vpop.f32.mrf.mxu1 }
 0x7c9   :  { %v2037_v55 = vadd.f32 %v2036_v20, %v1992_v24 }
 0x7cb   :  { %v2050_v0 = vmax.f32 %v2037_v55, 0.0 }
 0x7d0   :  { %v2038_v57 = vpop.f32.mrf.mxu1 }
 0x7d1   :  { %v2039_v62 = vadd.f32 %v2038_v57, %v1992_v24 }
 0x7d3   :  { %v2051_v46 = vmax.f32 %v2039_v62, 0.0 }
 0x7d5   :  { %v2056_v15 = vpack.c.bf16 %v2051_v46, %v2050_v0 }
 0x7d7   :  { %2591 = vmatmul.msk.bf16.gmra.mxu2 %vm56_vm0, %v2056_v15 }
 0x823   :  { %v2041_v39 = vpop.f32.mrf.mxu1 }
 0x824   :  { %v2042_v26 = vadd.f32 %v2041_v39, %v1992_v24 }
 0x826   :  { %v2052_v54 = vmax.f32 %v2042_v26, 0.0 }
 0x82b   :  { %v2043_v52 = vpop.f32.mrf.mxu1 }
 0x82c   :  { %v2044_v1 = vadd.f32 %v2043_v52, %v1992_v24 }
 0x82e   :  { %v2053_v38 = vmax.f32 %v2044_v1, 0.0 }
 0x830   :  { %v2057_v58 = vpack.c.bf16 %v2053_v38, %v2052_v54 }
 0x832   :  { %2592 = vmatmul.msk.bf16.gmra.mxu2 %vm56_vm0, %v2057_v58 }
 0x83a   :  { %v2096_v3 = vpop.f32.mrf.mxu2 }
 0x83b   :  { %v2097_v63 = vadd.f32 %v2096_v3, %v3827_v23 }
 0x83d   :  { %v2116_v43 = vmax.f32 %v2097_v63, 0.0 }
 0x83f   :  { %v3832_v27 = vadd.f32 %v2116_v43, %v3754_v29 }
 0x841   :  { %v2206_v8 = vrot.slane %v3832_v27, 4  ;;  %v2221_v0 = vrot.slane %v3832_v27, 5  ;;  %v2172_v46 = vrot.slane %v3832_v27, 2  ;;  %v2189_v26 = vrot.slane %v3832_v27, 3 }
 0x842   :  { %v2098_v19 = vpop.f32.mrf.mxu2  ;;  %v2238_v52 = vrot.slane %v3832_v27, 6 }
 0x843   :  { %v2099_v10 = vadd.f32 %v2098_v19, %v3827_v23 }
 0x845   :  { %v2117_v47 = vmax.f32 %v2099_v10, 0.0 }
 0x847   :  { %v3835_v42 = vadd.f32 %v2117_v47, %v3757_v49 }
 0x849   :  { %v2207_v45 = vrot.slane %v3835_v42, 3  ;;  %v2140_v12 = vrot.slane %v3835_v42, 7  ;;  %v2222_v20 = vrot.slane %v3835_v42, 4  ;;  %v2173_v55 = vrot.slane %v3835_v42, 1 }
 0x84a   :  { %v2101_v11 = vpop.f32.mrf.mxu2  ;;  %v2190_v38 = vrot.slane %v3835_v42, 2  ;;  %v2239_v58 = vrot.slane %v3835_v42, 5 }
 0x84b   :  { %v2102_v30 = vadd.f32 %v2101_v11, %v3827_v23  ;;  %v2208_v9 = vsel %vm472_vm11, %v2207_v45, %v2206_v8  ;;  %v2141_v13 = vsel %vm472_vm11, %v2140_v12, %v3832_v27  ;;  %v2223_v1 = vsel %vm472_vm11, %v2222_v20, %v2221_v0 }
 0x84c   :  { %v2174_v54 = vsel %vm472_vm11, %v2173_v55, %v2172_v46  ;;  %v2191_v46 = vsel %vm472_vm11, %v2190_v38, %v2189_v26 }
 0x84d   :  { %v2118_v22 = vmax.f32 %v2102_v30, 0.0 }
 0x84f   :  { %v3845_v29 = vadd.f32 %v2118_v22, %v3768_v7 }
 0x851   :  { %v2209_v21 = vrot.slane %v3845_v29, 2  ;;  %v2142_v4 = vrot.slane %v3845_v29, 6  ;;  %v2224_v62 = vrot.slane %v3845_v29, 3  ;;  %v2175_v63 = vsel %vm475_vm12, %v3845_v29, %v2174_v54 }
 0x852   :  { %v2103_v49 = vpop.f32.mrf.mxu2  ;;  %v2157_v43 = vrot.slane %v3845_v29, 7  ;;  %v2241_v55 = vrot.slane %v3845_v29, 4 }
 0x853   :  { %v2104_v16 = vadd.f32 %v2103_v49, %v3827_v23  ;;  %v2210_v18 = vsel %vm475_vm12, %v2209_v21, %v2208_v9  ;;  %v2143_v61 = vsel %vm475_vm12, %v2142_v4, %v2141_v13  ;;  %v2225_v3 = vsel %vm475_vm12, %v2224_v62, %v2223_v1 }
 0x855   :  { %v2119_v25 = vmax.f32 %v2104_v16, 0.0 }
 0x857   :  { %v3853_v34 = vadd.f32 %v2119_v25, %v3771_v40 }
 0x859   :  { %v2211_v50 = vrot.slane %v3853_v34, 1  ;;  %v2144_v7 = vrot.slane %v3853_v34, 5  ;;  %v2176_v10 = vrot.slane %v3853_v34, 7  ;;  %v2159_v47 = vrot.slane %v3853_v34, 6 }
 0x85a   :  { %v2106_v36 = vpop.f32.mrf.mxu2  ;;  %v2243_v62 = vrot.slane %v3853_v34, 3 }
 0x85b   :  { %v2107_v17 = vadd.f32 %v2106_v36, %v3827_v23  ;;  %v2212_v60 = vsel %vm478_vm14, %v2211_v50, %v2210_v18  ;;  %v2145_v24 = vsel %vm478_vm14, %v2144_v7, %v2143_v61  ;;  %v2177_v61 = vsel %vm478_vm14, %v2176_v10, %v2175_v63 }
 0x85d   :  { %v2120_v5 = vmax.f32 %v2107_v17, 0.0 }
 0x85f   :  { %v3861_v6 = vadd.f32 %v2120_v5, %v3781_v41 }
 0x861   :  { %v2213_v40 = vsel %vm481_vm13, %v3861_v6, %v2212_v60  ;;  %v2146_v44 = vrot.slane %v3861_v6, 4  ;;  %v2228_v12 = vrot.slane %v3861_v6, 1  ;;  %v2178_v30 = vrot.slane %v3861_v6, 6 }
 0x862   :  { %v2108_v48 = vpop.f32.mrf.mxu2  ;;  %v2161_v9 = vrot.slane %v3861_v6, 5  ;;  %v2245_v1 = vrot.slane %v3861_v6, 2 }
 0x863   :  { %v2109_v59 = vadd.f32 %v2108_v48, %v3827_v23  ;;  %v2147_v28 = vsel %vm481_vm13, %v2146_v44, %v2145_v24  ;;  %v2179_v60 = vsel %vm481_vm13, %v2178_v30, %v2177_v61  ;;  %v2192_v44 = vrot.slane %v3845_v29, 1 }
 0x865   :  { %v2121_v2 = vmax.f32 %v2109_v59, 0.0  ;;  %v2193_v54 = vsel %vm475_vm12, %v2192_v44, %v2191_v46 }
 0x867   :  { %v3869_v31 = vadd.f32 %v2121_v2, %v3784_v35  ;;  %v2155_v35 = vrot.slane %v3832_v27, 1 }
 0x869   :  { %v2214_v14 = vrot.slane %v3869_v31, 7  ;;  %v2148_v33 = vrot.slane %v3869_v31, 3  ;;  %v2156_v39 = vsel %vm472_vm11, %v3835_v42, %v2155_v35  ;;  %v2180_v13 = vrot.slane %v3869_v31, 5 }
 0x86a   :  { %v2163_v22 = vrot.slane %v3869_v31, 4  ;;  %v2247_v63 = vrot.slane %v3869_v31, 1 }
 0x86b   :  { %v2215_v41 = vsel %vm4023_vm15, %v2214_v14, %v2213_v40  ;;  %v2149_v51 = vsel %vm4024_vm2, %v2148_v33, %v2147_v28  ;;  %v2181_v48 = vsel %vm4026_vm10, %v2180_v13, %v2179_v60  ;;  %vm4031_vm15 = vmmov %vm4028_vm6 }
 0x86c   :  { %vm4032_vm2 = vmmov %vm4028_vm6 }
 0x86d   :  { %vm4034_vm10 = vmmov %vm4027_vm5 }
 0x8b5   :  { %v2111_v53 = vpop.f32.mrf.mxu2 }
 0x8b6   :  { %v2112_v56 = vadd.f32 %v2111_v53, %v3827_v23 }
 0x8b8   :  { %v2122_v57 = vmax.f32 %v2112_v56, 0.0 }
 0x8ba   :  { %v3883_v15 = vadd.f32 %v2122_v57, %v3802_v37  ;;  %v2226_v37 = vrot.slane %v3853_v34, 2  ;;  %v2195_v57 = vrot.slane %v3861_v6, 7 }
 0x8bc   :  { %v2216_v11 = vrot.slane %v3883_v15, 6  ;;  %v2150_v8 = vrot.slane %v3883_v15, 2  ;;  %v2227_v16 = vsel %vm478_vm14, %v2226_v37, %v2225_v3  ;;  %v2231_v18 = vrot.slane %v3883_v15, 7 }
 0x8bd   :  { %v2113_v19 = vpop.f32.mrf.mxu2  ;;  %v2182_v25 = vrot.slane %v3883_v15, 4  ;;  %v2165_v50 = vrot.slane %v3883_v15, 3  ;;  %v2229_v17 = vsel %vm481_vm13, %v2228_v12, %v2227_v16  ;;  %v2199_v3 = vrot.slane %v3883_v15, 5 }
 0x8be   :  { %v2114_v45 = vadd.f32 %v2113_v19, %v3827_v23  ;;  %v2217_v49 = vsel %vm487_vm1, %v2216_v11, %v2215_v41  ;;  %v2151_v21 = vsel %vm487_vm1, %v2150_v8, %v2149_v51  ;;  %v2158_v23 = vsel %vm475_vm12, %v2157_v43, %v2156_v39 }
 0x8bf   :  { %v2160_v36 = vsel %vm478_vm14, %v2159_v47, %v2158_v23  ;;  %v2230_v5 = vsel %vm4025_vm9, %v3869_v31, %v2229_v17  ;;  %v2183_v14 = vsel %vm487_vm1, %v2182_v25, %v2181_v48  ;;  %v2197_v39 = vrot.slane %v3869_v31, 6  ;;  %vm4033_vm9 = vmmov %vm4027_vm5 }
 0x8c0   :  { %v2123_v4 = vmax.f32 %v2114_v45, 0.0  ;;  %v2162_v24 = vsel %vm481_vm13, %v2161_v9, %v2160_v36  ;;  %v2232_v59 = vsel %vm487_vm1, %v2231_v18, %v2230_v5  ;;  %v2240_v37 = vsel %vm472_vm11, %v2239_v58, %v2238_v52 }
 0x8c1   :  { %v2164_v40 = vsel %vm4027_vm5, %v2163_v22, %v2162_v24  ;;  %v2194_v43 = vsel %vm478_vm14, %v3853_v34, %v2193_v54  ;;  %v2242_v26 = vsel %vm475_vm12, %v2241_v55, %v2240_v37  ;;  %v2256_v45 = vrot.slane %v3835_v42, 6  ;;  %vm4035_vm5 = vmmov %vm4032_vm2 }
 0x8c2   :  { %v3918_v7 = vadd.f32 %v2123_v4, %v3805_v32  ;;  %v2166_v33 = vsel %vm487_vm1, %v2165_v50, %v2164_v40  ;;  %v2196_v38 = vsel %vm481_vm13, %v2195_v57, %v2194_v43  ;;  %v2244_v10 = vsel %vm478_vm14, %v2243_v62, %v2242_v26 }
 0x8c3   :  { %v2198_v11 = vsel %vm4033_vm9, %v2197_v39, %v2196_v38  ;;  %v2246_v8 = vsel %vm481_vm13, %v2245_v1, %v2244_v10  ;;  %v2258_v9 = vrot.slane %v3845_v29, 5  ;;  %v2255_v22 = vrot.slane %v3832_v27, 7 }
 0x8c4   :  { %v2233_v32 = vrot.slane %v3918_v7, 6  ;;  %v2184_v28 = vrot.slane %v3918_v7, 3  ;;  %v2167_v2 = vrot.slane %v3918_v7, 2  ;;  %v2218_v41 = vrot.slane %v3918_v7, 5 }
 0x8c5   :  { %v2152_v51 = vrot.slane %v3918_v7, 1  ;;  %v2201_v19 = vrot.slane %v3918_v7, 4  ;;  %v2250_v47 = vrot.slane %v3918_v7, 7  ;;  %v2200_v52 = vsel %vm487_vm1, %v2199_v3, %v2198_v11 }
 0x8c6   :  { %v2234_v53 = vsel %vm4028_vm6, %v2233_v32, %v2232_v59  ;;  %v2185_v56 = vsel %vm4029_vm7, %v2184_v28, %v2183_v14  ;;  %v2168_v20 = vsel %vm4030_vm8, %v2167_v2, %v2166_v33  ;;  %v2219_v35 = vsel %vm4031_vm15, %v2218_v41, %v2217_v49  ;;  %vm4036_vm6 = vmmov %vm4032_vm2 }
 0x8c7   :  { %2235 = vrot.lane.b32.xlu1 %v2234_v53, %s2765_s22  ;;  %2186 = vrot.lane.b32.xlu2 %v2185_v56, %s2764_s21  ;;  %v2153_v0 = vsel %vm4032_vm2, %v2152_v51, %v2151_v21  ;;  %v2248_v58 = vsel %vm4034_vm10, %v2247_v63, %v2246_v8  ;;  %v2202_v12 = vsel %vm4035_vm5, %v2201_v19, %v2200_v52  ;;  %v2260_v49 = vrot.slane %v3853_v34, 4  ;;  %vm4037_vm7 = vmmov %vm4033_vm9 }
 0x8c8   :  { %2169 = vrot.lane.b32.xlu0 %v2168_v20, %s2765_s22  ;;  %v2249_v30 = vsel %vm487_vm1, %v3883_v15, %v2248_v58  ;;  %v2262_v21 = vrot.slane %v3861_v6, 3  ;;  %v2257_v42 = vsel %vm472_vm11, %v2256_v45, %v2255_v22  ;;  %v2264_v4 = vrot.slane %v3869_v31, 2  ;;  %vm4038_vm8 = vmmov %vm4032_vm2 }
 0x8c9   :  { %v2251_v13 = vsel %vm4036_vm6, %v2250_v47, %v2249_v30  ;;  %v2259_v16 = vsel %vm475_vm12, %v2258_v9, %v2257_v42  ;;  %v2266_v29 = vrot.slane %v3883_v15, 1 }
 0x8ca   :  { %v2261_v18 = vsel %vm478_vm14, %v2260_v49, %v2259_v16 }
 0x8cb   :  { %v2263_v23 = vsel %vm481_vm13, %v2262_v21, %v2261_v18 }
 0x8cc   :  { %v2265_v27 = vsel %vm4037_vm7, %v2264_v4, %v2263_v23 }
 0x8cd   :  { %v2267_v34 = vsel %vm487_vm1, %v2266_v29, %v2265_v27 }
 0x8ce   :  { %v2268_v61 = vsel %vm4038_vm8, %v3918_v7, %v2267_v34 }
 0x8cf   :  { %2203 = vrot.lane.b32.xlu1 %v2202_v12, %s2766_s23 }
 0x8d0   :  { %2252 = vrot.lane.b32.xlu0 %v2251_v13, %s2764_s21  ;;  %s2285_s21 = sshll.u32 %s2767_s12, 4  ;;  %s2286_s21 = int_to_ptr.vmem [resolvable:$true] %s2285_s21 }
 0x8d8   :  { %2269 = vrot.lane.b32.xlu0 %v2268_v61, %s2766_s23 }
 0x921   :  { %v2187_v36 = vpop.permute.xlu2 %2186 }
 0x939   :  { %v2236_v6 = vpop.permute.xlu1 %2235 }
 0x93a   :  { %v2170_v25 = vpop.permute.xlu0 %2169  ;;  %v2275_v7 = vsel %vm56_vm0, %v2219_v35, %v2236_v6 }
 0x93b   :  { %v2272_v31 = vsel %vm56_vm0, %v2153_v0, %v2170_v25 }
 0x93c   :  { %v2273_v15 = vsel %vm611_vm3, %v2272_v31, %v2187_v36 }
 0x941   :  { %v2204_v50 = vpop.permute.xlu1 %2203 }
 0x942   :  { %v2274_v17 = vsel %vm613_vm4, %v2273_v15, %v2204_v50  ;;  %v2253_v60 = vpop.permute.xlu0 %2252 }
 0x943   :  { %2278 = vst [vmem:[#allocation2] sm:$0xff] %v2274_v17  ;;  %v2276_v24 = vsel %vm611_vm3, %v2275_v7, %v2253_v60 }
 0x94a   :  { %v2270_v5 = vpop.permute.xlu0 %2269 }
 0x94b   :  { %v2277_v48 = vsel %vm613_vm4, %v2276_v24, %v2270_v5 }
 0x94c   :  { %2279 = vst [vmem:[#allocation2 + $0x8] sm:$0xff] %v2277_v48 }
 0x94d   :  { %2290 = dma.vmem_to_hbm [thread:$0]  %s2286_s21, 256, %s2288_s20, [#allocation3]  }
 0x94e   :  { %2761 = dma.done.wait [#allocation3], 256  }
 0x94f   :  { %2762 = vsyncadd [#allocation3], 4294967040 }
 0x950   :  { %2295 = vsyncpa [#allocation3], 1 }

</bundles_post_ra>
